<compile_context>
chip_gen: v5e
topology: v5e:2x2
jax: 0.10.0
libtpu: 0.0.40
codegen_flags: <defaults>
</compile_context>

<pallas_src>
import functools

import jax
import jax.numpy as jnp
from jax import lax
from jax.experimental import pallas as pl
from jax.experimental.pallas import tpu as pltpu


def _round_up(x, m):
    return (x + m - 1) // m * m


def _lstm_kernel(x_ref, wih_ref, whh_ref, b_ref, out_ref,
                 gx_ref, h_ref, c_ref, *, t_chunk, b_pad, h_pad):
    step = pl.program_id(0)

    @pl.when(step == 0)
    def _():
        h_ref[...] = jnp.zeros_like(h_ref)
        c_ref[...] = jnp.zeros_like(c_ref)

    # ---- Phase 1 (non-recurrent): input projection for the whole T-chunk in ONE ----
    # ---- MXU matmul (bf16 operands, f32 accumulation), staged sublane/lane aligned --
    gx = jnp.dot(x_ref[...], wih_ref[...],
                 preferred_element_type=jnp.float32) + b_ref[...]     # (t_chunk*B_pad, 4*H_pad) f32
    gx_ref[...] = gx.reshape(t_chunk, b_pad, 4 * h_pad)               # tile-aligned restage

    whh = whh_ref[...]                                                # (H_pad, 4*H_pad) bf16, resident

    # ---- Phase 2 (recurrent): tight fori_loop, only h/c carried ----
    def body(t, carry):
        h, c = carry                                                  # f32 (B_pad, H_pad)
        g = gx_ref[t] + jnp.dot(h.astype(whh.dtype), whh,
                                preferred_element_type=jnp.float32)   # (B_pad, 4*H_pad) f32
        # Gate axis was permuted in the wrapper to [i, f, o, g]: one sigmoid pass over
        # a contiguous 128-lane-aligned (B_pad, 3*H_pad) slab, one tanh over H_pad.
        sig = jax.nn.sigmoid(g[:, : 3 * h_pad])
        i_g = sig[:, 0 * h_pad: 1 * h_pad]
        f_g = sig[:, 1 * h_pad: 2 * h_pad]
        o_g = sig[:, 2 * h_pad: 3 * h_pad]
        g_g = jnp.tanh(g[:, 3 * h_pad:])
        c = f_g * c + i_g * g_g
        h = o_g * jnp.tanh(c)
        return h, c

    h, c = lax.fori_loop(0, t_chunk, body, (h_ref[...], c_ref[...]),
                         unroll=(t_chunk <= 16))
    h_ref[...] = h
    c_ref[...] = c

    @pl.when(step == pl.num_programs(0) - 1)
    def _():
        out_ref[...] = h.astype(out_ref.dtype)                        # lane-dense final write


def _reorder_pad_gate_rows(w, H, h_pad):
    """Rows grouped [i, f, g, o] (PyTorch) -> [i, f, o, g], each gate zero-padded to h_pad rows."""
    i, f, g, o = (w[k * H:(k + 1) * H] for k in range(4))
    blocks = []
    for blk in (i, f, o, g):
        pad = [(0, h_pad - H)] + [(0, 0)] * (blk.ndim - 1)
        blocks.append(jnp.pad(blk, pad))
    return jnp.concatenate(blocks, axis=0)


def _pick_t_chunk(T, b_pad, h_pad, max_gx_bytes=8 << 20):
    """Largest divisor of T whose f32 gx chunk stays under max_gx_bytes."""
    per_step = b_pad * 4 * h_pad * 4
    cap = max(1, max_gx_bytes // per_step)
    best = 1
    for d in range(1, T + 1):
        if T % d == 0 and d <= cap:
            best = d
    return best


def lstm_layers_forward(x, w_ih, w_hh, b_ih, b_hh, hidden_dim,
                        matmul_dtype=jnp.bfloat16):
    """x: (B, T, C) float32. Returns final hidden state of shape (B, H)
    (== hidden.squeeze() of single-layer nn.LSTM, batch_first=True, zero init state)."""
    B, T, C = x.shape
    H = hidden_dim
    h_pad = _round_up(H, 128)
    b_pad = _round_up(B, 8)
    t_chunk = _pick_t_chunk(T, b_pad, h_pad)
    n_chunks = T // t_chunk

    # ---- Layout plumbing (wrapper-side, off the serial critical path) ----
    # Gates permuted [i,f,g,o]->[i,f,o,g], zero-padded to H_pad per gate. Padded lanes
    # stay exactly 0 through the recurrence: zero weights+bias => gate preact 0 =>
    # c_pad = 0.5*c_pad (+0), h_pad = 0.5*tanh(c_pad) -> 0 from zero init.
    wih_t = jnp.transpose(_reorder_pad_gate_rows(w_ih, H, h_pad), (1, 0))      # (C, 4*H_pad)
    whh_p = _reorder_pad_gate_rows(w_hh, H, h_pad)                             # (4*H_pad, H)
    whh_t = jnp.transpose(jnp.pad(whh_p, ((0, 0), (0, h_pad - H))), (1, 0))    # (H_pad, 4*H_pad)
    bias = _reorder_pad_gate_rows(b_ih + b_hh, H, h_pad).reshape(1, 4 * h_pad)

    # Time-major, batch zero-padded to a sublane multiple, flattened for one matmul.
    x_tm = jnp.transpose(x, (1, 0, 2))                                         # (T, B, C)
    x_tm = jnp.pad(x_tm, ((0, 0), (0, b_pad - B), (0, 0)))                     # (T, B_pad, C)
    x_flat = x_tm.reshape(T * b_pad, C).astype(matmul_dtype)

    wih_t = wih_t.astype(matmul_dtype)
    whh_t = whh_t.astype(matmul_dtype)
    bias = bias.astype(jnp.float32)

    # ---- Explicit VMEM budget for the resident set (x2 for double-buffering) ----
    isz = jnp.dtype(matmul_dtype).itemsize
    vmem_bytes = 2 * (t_chunk * b_pad * C * isz          # streamed x chunk
                      + C * 4 * h_pad * isz              # W_ih^T
                      + h_pad * 4 * h_pad * isz          # W_hh^T
                      + 4 * h_pad * 4                    # bias
                      + b_pad * h_pad * 4)               # out block
    vmem_bytes += t_chunk * b_pad * 4 * h_pad * 4        # gx scratch
    vmem_bytes += 2 * b_pad * h_pad * 4                  # h, c carries
    vmem_limit = int(min(max(2 * vmem_bytes + (2 << 20), 4 << 20), 64 << 20))

    kernel = functools.partial(_lstm_kernel, t_chunk=t_chunk, b_pad=b_pad, h_pad=h_pad)

    out = pl.pallas_call(
        kernel,
        out_shape=jax.ShapeDtypeStruct((b_pad, h_pad), jnp.float32),
        grid_spec=pltpu.PrefetchScalarGridSpec(
            num_scalar_prefetch=0,
            grid=(n_chunks,),                                           # sequential over T-chunks
            in_specs=[
                pl.BlockSpec((t_chunk * b_pad, C), lambda i: (i, 0)),   # streamed x chunk
                pl.BlockSpec((C, 4 * h_pad), lambda i: (0, 0)),         # W_ih^T, resident
                pl.BlockSpec((h_pad, 4 * h_pad), lambda i: (0, 0)),     # W_hh^T, resident
                pl.BlockSpec((1, 4 * h_pad), lambda i: (0, 0)),         # bias, resident
            ],
            out_specs=pl.BlockSpec((b_pad, h_pad), lambda i: (0, 0)),   # lane-dense final h
            scratch_shapes=[
                pltpu.VMEM((t_chunk, b_pad, 4 * h_pad), jnp.float32),   # gx chunk (aligned)
                pltpu.VMEM((b_pad, h_pad), jnp.float32),                # h carry
                pltpu.VMEM((b_pad, h_pad), jnp.float32),                # c carry
            ],
        ),
        compiler_params=pltpu.CompilerParams(
            dimension_semantics=("arbitrary",),          # time recurrence is serial
            vmem_limit_bytes=vmem_limit,
        ),
    )(x_flat, wih_t, whh_t, bias)
    return out[:B, :H]


def _lstm_reference(x, w_ih, w_hh, b_ih, b_hh, hidden_dim):
    """Pure-JAX f32 reference of PyTorch nn.LSTM forward (single layer, zero init state)."""
    B, T, C = x.shape
    H = hidden_dim
    h = jnp.zeros((B, H), jnp.float32)
    c = jnp.zeros((B, H), jnp.float32)
    for t in range(T):
        gates = x[:, t, :] @ w_ih.T + h @ w_hh.T + b_ih + b_hh
        i = jax.nn.sigmoid(gates[:, 0 * H:1 * H])
        f = jax.nn.sigmoid(gates[:, 1 * H:2 * H])
        g = jnp.tanh(gates[:, 2 * H:3 * H])
        o = jax.nn.sigmoid(gates[:, 3 * H:4 * H])
        c = f * c + i * g
        h = o * jnp.tanh(c)
    return h


if __name__ == "__main__":
    # Module config maps to: T = in_size, C = in_channel, H = hidden_dim.
    B, T, C, H = 2, 8, 4, 32

    key = jax.random.PRNGKey(0)
    kx, k1, k2, k3, k4 = jax.random.split(key, 5)

    # PyTorch nn.LSTM default init: U(-1/sqrt(H), 1/sqrt(H)); deterministic synthetic params.
    bound = 1.0 / jnp.sqrt(jnp.float32(H))
    w_ih = jax.random.uniform(k1, (4 * H, C), jnp.float32, -bound, bound)
    w_hh = jax.random.uniform(k2, (4 * H, H), jnp.float32, -bound, bound)
    b_ih = jax.random.uniform(k3, (4 * H,), jnp.float32, -bound, bound)
    b_hh = jax.random.uniform(k4, (4 * H,), jnp.float32, -bound, bound)
    # NOTE: dropout=0.2 in nn.LSTM has no effect with num_layers=1 (forward unchanged).

    x = jax.random.normal(kx, (B, T, C), jnp.float32)

    out = lstm_layers_forward(x, w_ih, w_hh, b_ih, b_hh, H)
    out = jax.block_until_ready(out)

    ref = _lstm_reference(x, w_ih, w_hh, b_ih, b_hh, H)
    assert out.shape == (B, H)
    # bf16 matmul operands (f32 accumulation) vs the pure-f32 reference -> relaxed tolerance.
    assert jnp.allclose(out, ref, atol=1e-2, rtol=1e-2)

    print("KERNEL_OK")
</pallas_src>

<mosaic_0001>
module attributes {stable_mosaic.version = 11 : i64} {
  func.func @_lstm_kernel(%arg0: i32, %arg1: memref<64x4xbf16, #tpu.memory_space<vmem>>, %arg2: memref<4x512xbf16, #tpu.memory_space<vmem>>, %arg3: memref<128x512xbf16, #tpu.memory_space<vmem>>, %arg4: memref<1x512xf32, #tpu.memory_space<vmem>>, %arg5: memref<8x128xf32, #tpu.memory_space<vmem>>, %arg6: memref<8x8x512xf32, #tpu.memory_space<vmem>>, %arg7: memref<8x128xf32, #tpu.memory_space<vmem>>, %arg8: memref<8x128xf32, #tpu.memory_space<vmem>>) attributes {dimension_semantics = [#tpu.dimension_semantics<arbitrary>], iteration_bounds = array<i64: 1>, scalar_prefetch = 0 : i64, scratch_operands = 3 : i64, tpu.core_type = #tpu.core_type<tc>, window_params = [{transform_indices = @transform_0, window_bounds = array<i64: 64, 4>}, {pipeline_mode = #tpu.pipeline_mode<synchronous>, transform_indices = @transform_1, window_bounds = array<i64: 4, 512>}, {pipeline_mode = #tpu.pipeline_mode<synchronous>, transform_indices = @transform_2, window_bounds = array<i64: 128, 512>}, {pipeline_mode = #tpu.pipeline_mode<synchronous>, transform_indices = @transform_3, window_bounds = array<i64: 1, 512>}, {pipeline_mode = #tpu.pipeline_mode<synchronous>, transform_indices = @transform_4, window_bounds = array<i64: 8, 128>}]} {
    %c0_i32 = arith.constant 0 : i32
    %0 = arith.cmpi eq, %arg0, %c0_i32 : i32
    %1 = arith.extui %0 : i1 to i32
    %c0_i32_0 = arith.constant 0 : i32
    %2 = arith.cmpi ne, %1, %c0_i32_0 : i32
    scf.if %2 {
      %cst_54 = arith.constant 0.000000e+00 : f32
      %195 = vector.broadcast %cst_54 : f32 to vector<8x128xf32>
      %c0_55 = arith.constant 0 : index
      %c0_56 = arith.constant 0 : index
      %196 = vector.load %arg7[%c0_55, %c0_56] : memref<8x128xf32, #tpu.memory_space<vmem>>, vector<8x128xf32>
      tpu.vector_store %arg7[%c0_55, %c0_56], %195 {strides = array<i32>} : memref<8x128xf32, #tpu.memory_space<vmem>>, vector<8x128xf32>,
      %cst_57 = arith.constant 0.000000e+00 : f32
      %197 = vector.broadcast %cst_57 : f32 to vector<8x128xf32>
      %c0_58 = arith.constant 0 : index
      %c0_59 = arith.constant 0 : index
      %198 = vector.load %arg8[%c0_58, %c0_59] : memref<8x128xf32, #tpu.memory_space<vmem>>, vector<8x128xf32>
      tpu.vector_store %arg8[%c0_58, %c0_59], %197 {strides = array<i32>} : memref<8x128xf32, #tpu.memory_space<vmem>>, vector<8x128xf32>,
    } else {
    }
    %c0 = arith.constant 0 : index
    %c0_1 = arith.constant 0 : index
    %3 = vector.load %arg1[%c0, %c0_1] : memref<64x4xbf16, #tpu.memory_space<vmem>>, vector<64x4xbf16>
    %c0_2 = arith.constant 0 : index
    %c0_3 = arith.constant 0 : index
    %4 = vector.load %arg2[%c0_2, %c0_3] : memref<4x512xbf16, #tpu.memory_space<vmem>>, vector<4x512xbf16>
    %cst = arith.constant dense<0.000000e+00> : vector<64x512xf32>
    %5 = tpu.matmul %3, %4, %cst {dimension_numbers = #tpu.dot_dimension_numbers<[1], [0], [0], [1], [0, 0, 1, 1], [], []>} : vector<64x4xbf16>, vector<4x512xbf16>, vector<64x512xf32> -> vector<64x512xf32>
    %c0_4 = arith.constant 0 : index
    %c0_5 = arith.constant 0 : index
    %6 = vector.load %arg4[%c0_4, %c0_5] : memref<1x512xf32, #tpu.memory_space<vmem>>, vector<1x512xf32>
    %7 = vector.broadcast %6 : vector<1x512xf32> to vector<64x512xf32>
    %8 = arith.addf %5, %7 : vector<64x512xf32>
    %9 = vector.shape_cast %8 : vector<64x512xf32> to vector<8x8x512xf32>
    %c0_6 = arith.constant 0 : index
    %c0_7 = arith.constant 0 : index
    %c0_8 = arith.constant 0 : index
    %10 = vector.load %arg6[%c0_6, %c0_7, %c0_8] : memref<8x8x512xf32, #tpu.memory_space<vmem>>, vector<8x8x512xf32>
    tpu.vector_store %arg6[%c0_6, %c0_7, %c0_8], %9 {strides = array<i32>} : memref<8x8x512xf32, #tpu.memory_space<vmem>>, vector<8x8x512xf32>,
    %c0_9 = arith.constant 0 : index
    %c0_10 = arith.constant 0 : index
    %11 = vector.load %arg3[%c0_9, %c0_10] : memref<128x512xbf16, #tpu.memory_space<vmem>>, vector<128x512xbf16>
    %c0_11 = arith.constant 0 : index
    %c0_12 = arith.constant 0 : index
    %12 = vector.load %arg7[%c0_11, %c0_12] : memref<8x128xf32, #tpu.memory_space<vmem>>, vector<8x128xf32>
    %c0_13 = arith.constant 0 : index
    %c0_14 = arith.constant 0 : index
    %13 = vector.load %arg8[%c0_13, %c0_14] : memref<8x128xf32, #tpu.memory_space<vmem>>, vector<8x128xf32>
    %c0_i32_15 = arith.constant 0 : i32
    %14 = arith.index_cast %c0_i32_15 : i32 to index
    %c0_16 = arith.constant 0 : index
    %c0_17 = arith.constant 0 : index
    %15 = vector.load %arg6[%14, %c0_16, %c0_17] : memref<8x8x512xf32, #tpu.memory_space<vmem>>, vector<1x8x512xf32>
    %16 = vector.shape_cast %15 : vector<1x8x512xf32> to vector<8x512xf32>
    %17 = arith.truncf %12 : vector<8x128xf32> to vector<8x128xbf16>
    %cst_18 = arith.constant dense<0.000000e+00> : vector<8x512xf32>
    %18 = tpu.matmul %17, %11, %cst_18 {dimension_numbers = #tpu.dot_dimension_numbers<[1], [0], [0], [1], [0, 0, 1, 1], [], []>} : vector<8x128xbf16>, vector<128x512xbf16>, vector<8x512xf32> -> vector<8x512xf32>
    %19 = arith.addf %16, %18 : vector<8x512xf32>
    %20 = vector.extract_strided_slice %19 {offsets = [0, 0], sizes = [8, 384], strides = [1, 1]} : vector<8x512xf32> to vector<8x384xf32>
    %21 = arith.negf %20 : vector<8x384xf32>
    %22 = math.exp %21 : vector<8x384xf32>
    %cst_19 = arith.constant 1.000000e+00 : f32
    %23 = vector.broadcast %cst_19 : f32 to vector<8x384xf32>
    %24 = arith.addf %23, %22 : vector<8x384xf32>
    %25 = arith.divf %23, %24 : vector<8x384xf32>
    %26 = vector.extract_strided_slice %25 {offsets = [0, 0], sizes = [8, 128], strides = [1, 1]} : vector<8x384xf32> to vector<8x128xf32>
    %27 = vector.extract_strided_slice %25 {offsets = [0, 128], sizes = [8, 128], strides = [1, 1]} : vector<8x384xf32> to vector<8x128xf32>
    %28 = vector.extract_strided_slice %25 {offsets = [0, 256], sizes = [8, 128], strides = [1, 1]} : vector<8x384xf32> to vector<8x128xf32>
    %29 = vector.extract_strided_slice %19 {offsets = [0, 384], sizes = [8, 128], strides = [1, 1]} : vector<8x512xf32> to vector<8x128xf32>
    %30 = math.tanh %29 : vector<8x128xf32>
    %31 = arith.mulf %27, %13 : vector<8x128xf32>
    %32 = arith.mulf %26, %30 : vector<8x128xf32>
    %33 = arith.addf %31, %32 : vector<8x128xf32>
    %34 = math.tanh %33 : vector<8x128xf32>
    %35 = arith.mulf %28, %34 : vector<8x128xf32>
    %c1_i32 = arith.constant 1 : i32
    %36 = arith.index_cast %c1_i32 : i32 to index
    %c0_20 = arith.constant 0 : index
    %c0_21 = arith.constant 0 : index
    %37 = vector.load %arg6[%36, %c0_20, %c0_21] : memref<8x8x512xf32, #tpu.memory_space<vmem>>, vector<1x8x512xf32>
    %38 = vector.shape_cast %37 : vector<1x8x512xf32> to vector<8x512xf32>
    %39 = arith.truncf %35 : vector<8x128xf32> to vector<8x128xbf16>
    %cst_22 = arith.constant dense<0.000000e+00> : vector<8x512xf32>
    %40 = tpu.matmul %39, %11, %cst_22 {dimension_numbers = #tpu.dot_dimension_numbers<[1], [0], [0], [1], [0, 0, 1, 1], [], []>} : vector<8x128xbf16>, vector<128x512xbf16>, vector<8x512xf32> -> vector<8x512xf32>
    %41 = arith.addf %38, %40 : vector<8x512xf32>
    %42 = vector.extract_strided_slice %41 {offsets = [0, 0], sizes = [8, 384], strides = [1, 1]} : vector<8x512xf32> to vector<8x384xf32>
    %43 = arith.negf %42 : vector<8x384xf32>
    %44 = math.exp %43 : vector<8x384xf32>
    %cst_23 = arith.constant 1.000000e+00 : f32
    %45 = vector.broadcast %cst_23 : f32 to vector<8x384xf32>
    %46 = arith.addf %45, %44 : vector<8x384xf32>
    %47 = arith.divf %45, %46 : vector<8x384xf32>
    %48 = vector.extract_strided_slice %47 {offsets = [0, 0], sizes = [8, 128], strides = [1, 1]} : vector<8x384xf32> to vector<8x128xf32>
    %49 = vector.extract_strided_slice %47 {offsets = [0, 128], sizes = [8, 128], strides = [1, 1]} : vector<8x384xf32> to vector<8x128xf32>
    %50 = vector.extract_strided_slice %47 {offsets = [0, 256], sizes = [8, 128], strides = [1, 1]} : vector<8x384xf32> to vector<8x128xf32>
    %51 = vector.extract_strided_slice %41 {offsets = [0, 384], sizes = [8, 128], strides = [1, 1]} : vector<8x512xf32> to vector<8x128xf32>
    %52 = math.tanh %51 : vector<8x128xf32>
    %53 = arith.mulf %49, %33 : vector<8x128xf32>
    %54 = arith.mulf %48, %52 : vector<8x128xf32>
    %55 = arith.addf %53, %54 : vector<8x128xf32>
    %56 = math.tanh %55 : vector<8x128xf32>
    %57 = arith.mulf %50, %56 : vector<8x128xf32>
    %c2_i32 = arith.constant 2 : i32
    %58 = arith.index_cast %c2_i32 : i32 to index
    %c0_24 = arith.constant 0 : index
    %c0_25 = arith.constant 0 : index
    %59 = vector.load %arg6[%58, %c0_24, %c0_25] : memref<8x8x512xf32, #tpu.memory_space<vmem>>, vector<1x8x512xf32>
    %60 = vector.shape_cast %59 : vector<1x8x512xf32> to vector<8x512xf32>
    %61 = arith.truncf %57 : vector<8x128xf32> to vector<8x128xbf16>
    %cst_26 = arith.constant dense<0.000000e+00> : vector<8x512xf32>
    %62 = tpu.matmul %61, %11, %cst_26 {dimension_numbers = #tpu.dot_dimension_numbers<[1], [0], [0], [1], [0, 0, 1, 1], [], []>} : vector<8x128xbf16>, vector<128x512xbf16>, vector<8x512xf32> -> vector<8x512xf32>
    %63 = arith.addf %60, %62 : vector<8x512xf32>
    %64 = vector.extract_strided_slice %63 {offsets = [0, 0], sizes = [8, 384], strides = [1, 1]} : vector<8x512xf32> to vector<8x384xf32>
    %65 = arith.negf %64 : vector<8x384xf32>
    %66 = math.exp %65 : vector<8x384xf32>
    %cst_27 = arith.constant 1.000000e+00 : f32
    %67 = vector.broadcast %cst_27 : f32 to vector<8x384xf32>
    %68 = arith.addf %67, %66 : vector<8x384xf32>
    %69 = arith.divf %67, %68 : vector<8x384xf32>
    %70 = vector.extract_strided_slice %69 {offsets = [0, 0], sizes = [8, 128], strides = [1, 1]} : vector<8x384xf32> to vector<8x128xf32>
    %71 = vector.extract_strided_slice %69 {offsets = [0, 128], sizes = [8, 128], strides = [1, 1]} : vector<8x384xf32> to vector<8x128xf32>
    %72 = vector.extract_strided_slice %69 {offsets = [0, 256], sizes = [8, 128], strides = [1, 1]} : vector<8x384xf32> to vector<8x128xf32>
    %73 = vector.extract_strided_slice %63 {offsets = [0, 384], sizes = [8, 128], strides = [1, 1]} : vector<8x512xf32> to vector<8x128xf32>
    %74 = math.tanh %73 : vector<8x128xf32>
    %75 = arith.mulf %71, %55 : vector<8x128xf32>
    %76 = arith.mulf %70, %74 : vector<8x128xf32>
    %77 = arith.addf %75, %76 : vector<8x128xf32>
    %78 = math.tanh %77 : vector<8x128xf32>
    %79 = arith.mulf %72, %78 : vector<8x128xf32>
    %c3_i32 = arith.constant 3 : i32
    %80 = arith.index_cast %c3_i32 : i32 to index
    %c0_28 = arith.constant 0 : index
    %c0_29 = arith.constant 0 : index
    %81 = vector.load %arg6[%80, %c0_28, %c0_29] : memref<8x8x512xf32, #tpu.memory_space<vmem>>, vector<1x8x512xf32>
    %82 = vector.shape_cast %81 : vector<1x8x512xf32> to vector<8x512xf32>
    %83 = arith.truncf %79 : vector<8x128xf32> to vector<8x128xbf16>
    %cst_30 = arith.constant dense<0.000000e+00> : vector<8x512xf32>
    %84 = tpu.matmul %83, %11, %cst_30 {dimension_numbers = #tpu.dot_dimension_numbers<[1], [0], [0], [1], [0, 0, 1, 1], [], []>} : vector<8x128xbf16>, vector<128x512xbf16>, vector<8x512xf32> -> vector<8x512xf32>
    %85 = arith.addf %82, %84 : vector<8x512xf32>
    %86 = vector.extract_strided_slice %85 {offsets = [0, 0], sizes = [8, 384], strides = [1, 1]} : vector<8x512xf32> to vector<8x384xf32>
    %87 = arith.negf %86 : vector<8x384xf32>
    %88 = math.exp %87 : vector<8x384xf32>
    %cst_31 = arith.constant 1.000000e+00 : f32
    %89 = vector.broadcast %cst_31 : f32 to vector<8x384xf32>
    %90 = arith.addf %89, %88 : vector<8x384xf32>
    %91 = arith.divf %89, %90 : vector<8x384xf32>
    %92 = vector.extract_strided_slice %91 {offsets = [0, 0], sizes = [8, 128], strides = [1, 1]} : vector<8x384xf32> to vector<8x128xf32>
    %93 = vector.extract_strided_slice %91 {offsets = [0, 128], sizes = [8, 128], strides = [1, 1]} : vector<8x384xf32> to vector<8x128xf32>
    %94 = vector.extract_strided_slice %91 {offsets = [0, 256], sizes = [8, 128], strides = [1, 1]} : vector<8x384xf32> to vector<8x128xf32>
    %95 = vector.extract_strided_slice %85 {offsets = [0, 384], sizes = [8, 128], strides = [1, 1]} : vector<8x512xf32> to vector<8x128xf32>
    %96 = math.tanh %95 : vector<8x128xf32>
    %97 = arith.mulf %93, %77 : vector<8x128xf32>
    %98 = arith.mulf %92, %96 : vector<8x128xf32>
    %99 = arith.addf %97, %98 : vector<8x128xf32>
    %100 = math.tanh %99 : vector<8x128xf32>
    %101 = arith.mulf %94, %100 : vector<8x128xf32>
    %c4_i32 = arith.constant 4 : i32
    %102 = arith.index_cast %c4_i32 : i32 to index
    %c0_32 = arith.constant 0 : index
    %c0_33 = arith.constant 0 : index
    %103 = vector.load %arg6[%102, %c0_32, %c0_33] : memref<8x8x512xf32, #tpu.memory_space<vmem>>, vector<1x8x512xf32>
    %104 = vector.shape_cast %103 : vector<1x8x512xf32> to vector<8x512xf32>
    %105 = arith.truncf %101 : vector<8x128xf32> to vector<8x128xbf16>
    %cst_34 = arith.constant dense<0.000000e+00> : vector<8x512xf32>
    %106 = tpu.matmul %105, %11, %cst_34 {dimension_numbers = #tpu.dot_dimension_numbers<[1], [0], [0], [1], [0, 0, 1, 1], [], []>} : vector<8x128xbf16>, vector<128x512xbf16>, vector<8x512xf32> -> vector<8x512xf32>
    %107 = arith.addf %104, %106 : vector<8x512xf32>
    %108 = vector.extract_strided_slice %107 {offsets = [0, 0], sizes = [8, 384], strides = [1, 1]} : vector<8x512xf32> to vector<8x384xf32>
    %109 = arith.negf %108 : vector<8x384xf32>
    %110 = math.exp %109 : vector<8x384xf32>
    %cst_35 = arith.constant 1.000000e+00 : f32
    %111 = vector.broadcast %cst_35 : f32 to vector<8x384xf32>
    %112 = arith.addf %111, %110 : vector<8x384xf32>
    %113 = arith.divf %111, %112 : vector<8x384xf32>
    %114 = vector.extract_strided_slice %113 {offsets = [0, 0], sizes = [8, 128], strides = [1, 1]} : vector<8x384xf32> to vector<8x128xf32>
    %115 = vector.extract_strided_slice %113 {offsets = [0, 128], sizes = [8, 128], strides = [1, 1]} : vector<8x384xf32> to vector<8x128xf32>
    %116 = vector.extract_strided_slice %113 {offsets = [0, 256], sizes = [8, 128], strides = [1, 1]} : vector<8x384xf32> to vector<8x128xf32>
    %117 = vector.extract_strided_slice %107 {offsets = [0, 384], sizes = [8, 128], strides = [1, 1]} : vector<8x512xf32> to vector<8x128xf32>
    %118 = math.tanh %117 : vector<8x128xf32>
    %119 = arith.mulf %115, %99 : vector<8x128xf32>
    %120 = arith.mulf %114, %118 : vector<8x128xf32>
    %121 = arith.addf %119, %120 : vector<8x128xf32>
    %122 = math.tanh %121 : vector<8x128xf32>
    %123 = arith.mulf %116, %122 : vector<8x128xf32>
    %c5_i32 = arith.constant 5 : i32
    %124 = arith.index_cast %c5_i32 : i32 to index
    %c0_36 = arith.constant 0 : index
    %c0_37 = arith.constant 0 : index
    %125 = vector.load %arg6[%124, %c0_36, %c0_37] : memref<8x8x512xf32, #tpu.memory_space<vmem>>, vector<1x8x512xf32>
    %126 = vector.shape_cast %125 : vector<1x8x512xf32> to vector<8x512xf32>
    %127 = arith.truncf %123 : vector<8x128xf32> to vector<8x128xbf16>
    %cst_38 = arith.constant dense<0.000000e+00> : vector<8x512xf32>
    %128 = tpu.matmul %127, %11, %cst_38 {dimension_numbers = #tpu.dot_dimension_numbers<[1], [0], [0], [1], [0, 0, 1, 1], [], []>} : vector<8x128xbf16>, vector<128x512xbf16>, vector<8x512xf32> -> vector<8x512xf32>
    %129 = arith.addf %126, %128 : vector<8x512xf32>
    %130 = vector.extract_strided_slice %129 {offsets = [0, 0], sizes = [8, 384], strides = [1, 1]} : vector<8x512xf32> to vector<8x384xf32>
    %131 = arith.negf %130 : vector<8x384xf32>
    %132 = math.exp %131 : vector<8x384xf32>
    %cst_39 = arith.constant 1.000000e+00 : f32
    %133 = vector.broadcast %cst_39 : f32 to vector<8x384xf32>
    %134 = arith.addf %133, %132 : vector<8x384xf32>
    %135 = arith.divf %133, %134 : vector<8x384xf32>
    %136 = vector.extract_strided_slice %135 {offsets = [0, 0], sizes = [8, 128], strides = [1, 1]} : vector<8x384xf32> to vector<8x128xf32>
    %137 = vector.extract_strided_slice %135 {offsets = [0, 128], sizes = [8, 128], strides = [1, 1]} : vector<8x384xf32> to vector<8x128xf32>
    %138 = vector.extract_strided_slice %135 {offsets = [0, 256], sizes = [8, 128], strides = [1, 1]} : vector<8x384xf32> to vector<8x128xf32>
    %139 = vector.extract_strided_slice %129 {offsets = [0, 384], sizes = [8, 128], strides = [1, 1]} : vector<8x512xf32> to vector<8x128xf32>
    %140 = math.tanh %139 : vector<8x128xf32>
    %141 = arith.mulf %137, %121 : vector<8x128xf32>
    %142 = arith.mulf %136, %140 : vector<8x128xf32>
    %143 = arith.addf %141, %142 : vector<8x128xf32>
    %144 = math.tanh %143 : vector<8x128xf32>
    %145 = arith.mulf %138, %144 : vector<8x128xf32>
    %c6_i32 = arith.constant 6 : i32
    %146 = arith.index_cast %c6_i32 : i32 to index
    %c0_40 = arith.constant 0 : index
    %c0_41 = arith.constant 0 : index
    %147 = vector.load %arg6[%146, %c0_40, %c0_41] : memref<8x8x512xf32, #tpu.memory_space<vmem>>, vector<1x8x512xf32>
    %148 = vector.shape_cast %147 : vector<1x8x512xf32> to vector<8x512xf32>
    %149 = arith.truncf %145 : vector<8x128xf32> to vector<8x128xbf16>
    %cst_42 = arith.constant dense<0.000000e+00> : vector<8x512xf32>
    %150 = tpu.matmul %149, %11, %cst_42 {dimension_numbers = #tpu.dot_dimension_numbers<[1], [0], [0], [1], [0, 0, 1, 1], [], []>} : vector<8x128xbf16>, vector<128x512xbf16>, vector<8x512xf32> -> vector<8x512xf32>
    %151 = arith.addf %148, %150 : vector<8x512xf32>
    %152 = vector.extract_strided_slice %151 {offsets = [0, 0], sizes = [8, 384], strides = [1, 1]} : vector<8x512xf32> to vector<8x384xf32>
    %153 = arith.negf %152 : vector<8x384xf32>
    %154 = math.exp %153 : vector<8x384xf32>
    %cst_43 = arith.constant 1.000000e+00 : f32
    %155 = vector.broadcast %cst_43 : f32 to vector<8x384xf32>
    %156 = arith.addf %155, %154 : vector<8x384xf32>
    %157 = arith.divf %155, %156 : vector<8x384xf32>
    %158 = vector.extract_strided_slice %157 {offsets = [0, 0], sizes = [8, 128], strides = [1, 1]} : vector<8x384xf32> to vector<8x128xf32>
    %159 = vector.extract_strided_slice %157 {offsets = [0, 128], sizes = [8, 128], strides = [1, 1]} : vector<8x384xf32> to vector<8x128xf32>
    %160 = vector.extract_strided_slice %157 {offsets = [0, 256], sizes = [8, 128], strides = [1, 1]} : vector<8x384xf32> to vector<8x128xf32>
    %161 = vector.extract_strided_slice %151 {offsets = [0, 384], sizes = [8, 128], strides = [1, 1]} : vector<8x512xf32> to vector<8x128xf32>
    %162 = math.tanh %161 : vector<8x128xf32>
    %163 = arith.mulf %159, %143 : vector<8x128xf32>
    %164 = arith.mulf %158, %162 : vector<8x128xf32>
    %165 = arith.addf %163, %164 : vector<8x128xf32>
    %166 = math.tanh %165 : vector<8x128xf32>
    %167 = arith.mulf %160, %166 : vector<8x128xf32>
    %c7_i32 = arith.constant 7 : i32
    %168 = arith.index_cast %c7_i32 : i32 to index
    %c0_44 = arith.constant 0 : index
    %c0_45 = arith.constant 0 : index
    %169 = vector.load %arg6[%168, %c0_44, %c0_45] : memref<8x8x512xf32, #tpu.memory_space<vmem>>, vector<1x8x512xf32>
    %170 = vector.shape_cast %169 : vector<1x8x512xf32> to vector<8x512xf32>
    %171 = arith.truncf %167 : vector<8x128xf32> to vector<8x128xbf16>
    %cst_46 = arith.constant dense<0.000000e+00> : vector<8x512xf32>
    %172 = tpu.matmul %171, %11, %cst_46 {dimension_numbers = #tpu.dot_dimension_numbers<[1], [0], [0], [1], [0, 0, 1, 1], [], []>} : vector<8x128xbf16>, vector<128x512xbf16>, vector<8x512xf32> -> vector<8x512xf32>
    %173 = arith.addf %170, %172 : vector<8x512xf32>
    %174 = vector.extract_strided_slice %173 {offsets = [0, 0], sizes = [8, 384], strides = [1, 1]} : vector<8x512xf32> to vector<8x384xf32>
    %175 = arith.negf %174 : vector<8x384xf32>
    %176 = math.exp %175 : vector<8x384xf32>
    %cst_47 = arith.constant 1.000000e+00 : f32
    %177 = vector.broadcast %cst_47 : f32 to vector<8x384xf32>
    %178 = arith.addf %177, %176 : vector<8x384xf32>
    %179 = arith.divf %177, %178 : vector<8x384xf32>
    %180 = vector.extract_strided_slice %179 {offsets = [0, 0], sizes = [8, 128], strides = [1, 1]} : vector<8x384xf32> to vector<8x128xf32>
    %181 = vector.extract_strided_slice %179 {offsets = [0, 128], sizes = [8, 128], strides = [1, 1]} : vector<8x384xf32> to vector<8x128xf32>
    %182 = vector.extract_strided_slice %179 {offsets = [0, 256], sizes = [8, 128], strides = [1, 1]} : vector<8x384xf32> to vector<8x128xf32>
    %183 = vector.extract_strided_slice %173 {offsets = [0, 384], sizes = [8, 128], strides = [1, 1]} : vector<8x512xf32> to vector<8x128xf32>
    %184 = math.tanh %183 : vector<8x128xf32>
    %185 = arith.mulf %181, %165 : vector<8x128xf32>
    %186 = arith.mulf %180, %184 : vector<8x128xf32>
    %187 = arith.addf %185, %186 : vector<8x128xf32>
    %188 = math.tanh %187 : vector<8x128xf32>
    %189 = arith.mulf %182, %188 : vector<8x128xf32>
    %c8_i32 = arith.constant 8 : i32
    %c0_48 = arith.constant 0 : index
    %c0_49 = arith.constant 0 : index
    %190 = vector.load %arg7[%c0_48, %c0_49] : memref<8x128xf32, #tpu.memory_space<vmem>>, vector<8x128xf32>
    tpu.vector_store %arg7[%c0_48, %c0_49], %189 {strides = array<i32>} : memref<8x128xf32, #tpu.memory_space<vmem>>, vector<8x128xf32>,
    %c0_50 = arith.constant 0 : index
    %c0_51 = arith.constant 0 : index
    %191 = vector.load %arg8[%c0_50, %c0_51] : memref<8x128xf32, #tpu.memory_space<vmem>>, vector<8x128xf32>
    tpu.vector_store %arg8[%c0_50, %c0_51], %187 {strides = array<i32>} : memref<8x128xf32, #tpu.memory_space<vmem>>, vector<8x128xf32>,
    %c0_i32_52 = arith.constant 0 : i32
    %192 = arith.cmpi eq, %arg0, %c0_i32_52 : i32
    %193 = arith.extui %192 : i1 to i32
    %c0_i32_53 = arith.constant 0 : i32
    %194 = arith.cmpi ne, %193, %c0_i32_53 : i32
    scf.if %194 {
      %c0_54 = arith.constant 0 : index
      %c0_55 = arith.constant 0 : index
      %195 = vector.load %arg5[%c0_54, %c0_55] : memref<8x128xf32, #tpu.memory_space<vmem>>, vector<8x128xf32>
      tpu.vector_store %arg5[%c0_54, %c0_55], %189 {strides = array<i32>} : memref<8x128xf32, #tpu.memory_space<vmem>>, vector<8x128xf32>,
    } else {
    }
    return
  }
  func.func @transform_0(%arg0: i32) -> (i32, i32) {
    %c0_i32 = arith.constant 0 : i32
    %c0_i32_0 = arith.constant 0 : i32
    return %arg0, %c0_i32 : i32, i32
  }
  func.func @transform_1(%arg0: i32) -> (i32, i32) {
    %c0_i32 = arith.constant 0 : i32
    %c0_i32_0 = arith.constant 0 : i32
    %c0_i32_1 = arith.constant 0 : i32
    return %c0_i32, %c0_i32_0 : i32, i32
  }
  func.func @transform_2(%arg0: i32) -> (i32, i32) {
    %c0_i32 = arith.constant 0 : i32
    %c0_i32_0 = arith.constant 0 : i32
    %c0_i32_1 = arith.constant 0 : i32
    return %c0_i32, %c0_i32_0 : i32, i32
  }
  func.func @transform_3(%arg0: i32) -> (i32, i32) {
    %c0_i32 = arith.constant 0 : i32
    %c0_i32_0 = arith.constant 0 : i32
    %c0_i32_1 = arith.constant 0 : i32
    return %c0_i32, %c0_i32_0 : i32, i32
  }
  func.func @transform_4(%arg0: i32) -> (i32, i32) {
    %c0_i32 = arith.constant 0 : i32
    %c0_i32_0 = arith.constant 0 : i32
    %c0_i32_1 = arith.constant 0 : i32
    return %c0_i32, %c0_i32_0 : i32, i32
  }
}

</mosaic_0001>

<bundles_post_ra>
// kernel: tpu_custom_call.1
= control target key start
LH: loop header
LB: loop body
LE: loop exit
PB: predicated region body
PF: predicated region fallthrough
CT: control target
= control target key end

     0   :  { %9 = vsyncpa [#allocation6], 0  ;;  %s2399_s0 = inlined_call_operand.vmem [shape: bf16[64,4], index: 0, kind: input, shape index: {}]   ;;  %s2400_s1 = inlined_call_operand.vmem [shape: bf16[4,512], index: 1, kind: input, shape index: {}]   ;;  %s2401_s2 = inlined_call_operand.hbm [shape: bf16[128,512], index: 2, kind: input, shape index: {}]   ;;  %s2402_s3 = inlined_call_operand.vmem [shape: f32[1,512], index: 3, kind: input, shape index: {}]   ;;  %s2403_s4 = inlined_call_operand.hbm [shape: f32[8,128], index: 4, kind: output, shape index: {}]  }
   0x1   :  { %10 = vsyncpa [#allocation7], 0  ;;  %s19_s17 = sshll.u32 %s2401_s2, 4  ;;  %s1877_s18 = smov [#allocation5]   ;;  %s20_s17 = int_to_ptr.hbm [resolvable:$true] %s19_s17 }
   0x2   :  { %s21_s19 = sshll.u32 %s1877_s18, 4  ;;  %s1878_s20 = smov 256   ;;  %s22_s19 = int_to_ptr.vmem [resolvable:$true] %s21_s19 }
   0x3   :  { %s1879_s21 = smov 16  }
   0x4   :  { %27 = dma.hbm_to_vmem [thread:$0]  %s20_s17, 4096, %s22_s19, [#allocation6], %s1878_s20, %s1878_s20, %s1879_s21  }
   0x5   :  { %1873 = dma.done.wait [#allocation6], 4096  }
   0x6   :  { %1874 = vsyncadd [#allocation6], 4294963200  ;;  %v49_v0 = vld [vmem:[%s2400_s1] sm:$0xff]  ;;  %v1618_v1 = vld [vmem:[#allocation5 + $0xe0] sm:$0xf]  ;;  %vm99_vm0 = vcmask 1041408  }
   0x7   :  { %81 = vst [vmem:[#allocation1] ss:$4 sm:$0xff] %v49_v0  ;;  %v1690_v2 = vld [vmem:[#allocation5 + $0xec] sm:$0xf0]  ;;  %v1688_v3 = vld [vmem:[#allocation5 + $0xe4] sm:$0xf] }
   0x8   :  { %v1620_v4 = vld [vmem:[#allocation5 + $0xf0] sm:$0xf0]  ;;  %v1626_v5 = vld [vmem:[#allocation5 + $0xe8] sm:$0xf]  ;;  %v1691_v6 = vld [vmem:[#allocation5 + $0xf4] sm:$0xf0]  ;;  %v1913_v7 = vor.u32 %v1690_v2, %v1618_v1 }
   0x9   :  { %v1602_v8 = vld [vmem:[#allocation5 + $0xc0] sm:$0xf]  ;;  %v1686_v9 = vld [vmem:[#allocation5 + $0xcc] sm:$0xf0]  ;;  %v1684_v10 = vld [vmem:[#allocation5 + $0xc4] sm:$0xf]  ;;  %v1915_v16 = vor.u32 %v1688_v3, %v1620_v4  ;;  %v1927_v25 = vor.u32 %v1691_v6, %v1626_v5 }
   0xa   :  { %v1604_v11 = vld [vmem:[#allocation5 + $0xd0] sm:$0xf0]  ;;  %v1689_v12 = vld [vmem:[#allocation5 + $0xec] sm:$0xf]  ;;  %v1628_v13 = vld [vmem:[#allocation5 + $0xf8] sm:$0xf0]  ;;  %v1930_v28 = vor.u32 %v1686_v9, %v1602_v8 }
   0xb   :  { %v1656_v20 = vld [vmem:[%s2399_s0] sm:$0xff]  ;;  %vm86_vm1 = vcmask 31744   ;;  %v1923_v23 = vor.u32 %v1689_v12, %v1628_v13  ;;  %v1685_v26 = vld [vmem:[#allocation5 + $0xcc] sm:$0xf]  ;;  %v1932_v29 = vor.u32 %v1684_v10, %v1604_v11  ;;  %v1610_v30 = vld [vmem:[#allocation5 + $0xc8] sm:$0xf] }
   0xc   :  { %v1612_v27 = vld [vmem:[#allocation5 + $0xd8] sm:$0xf0]  ;;  %v1687_v31 = vld [vmem:[#allocation5 + $0xd4] sm:$0xf0]  ;;  %v1586_v32 = vld [vmem:[#allocation5 + $0xa0] sm:$0xf] }
   0xd   :  { %v1682_v33 = vld [vmem:[#allocation5 + $0xac] sm:$0xf0]  ;;  %v1680_v34 = vld [vmem:[#allocation5 + $0xa4] sm:$0xf]  ;;  %v1588_v35 = vld [vmem:[#allocation5 + $0xb0] sm:$0xf0]  ;;  %v1938_v36 = vor.u32 %v1685_v26, %v1612_v27  ;;  %v1942_v37 = vor.u32 %v1687_v31, %v1610_v30 }
   0xe   :  { %v82_v14 = vld.sshfl [vmem:[#allocation1] sm:$0xff pattern:$0x73625140]  ;;  %v83_v15 = vld.sshfl [vmem:[#allocation1 + $0x8] sm:$0xff pattern:$0x73625140]  ;;  %v1946_v40 = vor.u32 %v1682_v33, %v1586_v32  ;;  %v1948_v41 = vor.u32 %v1680_v34, %v1588_v35 }
   0xf   :  { %v100_v17 = vsel %vm99_vm0, %v82_v14, 0  ;;  %v102_v18 = vsel %vm99_vm0, %v83_v15, 0  ;;  %v84_v19 = vld.sshfl [vmem:[#allocation1 + $0x10] sm:$0xff pattern:$0x73625140]  ;;  %v1657_v61 = vld [vmem:[%s2399_s0 + $0x8] sm:$0xff] }
  0x10   :  { %115 = vmatpush.bf16.msra.mxu0 %v100_v17  ;;  %144 = vmatpush.bf16.msra.mxu1 %v102_v18  ;;  %v104_v21 = vsel %vm99_vm0, %v84_v19, 0  ;;  %v85_v22 = vld.sshfl [vmem:[#allocation1 + $0x18] sm:$0xff pattern:$0x73625140]  ;;  %v1681_v38 = vld [vmem:[#allocation5 + $0xac] sm:$0xf] }
  0x11   :  { %173 = vmatpush.bf16.msra.mxu2 %v104_v21  ;;  %v106_v24 = vsel %vm99_vm0, %v85_v22, 0  ;;  %v1596_v39 = vld [vmem:[#allocation5 + $0xb8] sm:$0xf0]  ;;  %v1594_v42 = vld [vmem:[#allocation5 + $0xa8] sm:$0xf]  ;;  %s1462_s8 = sshll.u32 %s2403_s4, 4  ;;  %s1463_s8 = int_to_ptr.hbm [resolvable:$true] %s1462_s8 }
  0x12   :  { %202 = vmatpush.bf16.msra.mxu3 %v106_v24  ;;  %v1683_v43 = vld [vmem:[#allocation5 + $0xb4] sm:$0xf0]  ;;  %v1570_v44 = vld [vmem:[#allocation5 + $0x80] sm:$0xf]  ;;  %v1678_v45 = vld [vmem:[#allocation5 + $0x8c] sm:$0xf0]  ;;  %v1951_v48 = vor.u32 %v1681_v38, %v1596_v39 }
  0x13   :  { %1488 = vmatmul.msk.bf16.vlgmr.msra.gmra.mxu0 %vm86_vm1, %v1656_v20  ;;  %1492 = vmatmul.msk.bf16.vlgmr.msra.gmra.mxu1 %vm86_vm1, %v1656_v20  ;;  %v1676_v46 = vld [vmem:[#allocation5 + $0x84] sm:$0xf]  ;;  %v1572_v47 = vld [vmem:[#allocation5 + $0x90] sm:$0xf0]  ;;  %v1954_v49 = vor.u32 %v1683_v43, %v1594_v42  ;;  %v1677_v50 = vld [vmem:[#allocation5 + $0x8c] sm:$0xf]  ;;  %v1958_v52 = vor.u32 %v1678_v45, %v1570_v44 }
  0x14   :  { %455 = vmatpush.bf16.msrb.mxu0 %v1913_v7  ;;  %468 = vmatpush.bf16.msrb.mxu1 %v1915_v16  ;;  %v1580_v51 = vld [vmem:[#allocation5 + $0x98] sm:$0xf0]  ;;  %v1960_v53 = vor.u32 %v1676_v46, %v1572_v47  ;;  %v1578_v54 = vld [vmem:[#allocation5 + $0x88] sm:$0xf]  ;;  %v1679_v55 = vld [vmem:[#allocation5 + $0x94] sm:$0xf0] }
  0x15   :  { %1496 = vmatmul.msk.bf16.vlgmr.msra.gmra.mxu2 %vm86_vm1, %v1656_v20  ;;  %1500 = vmatmul.msk.bf16.vlgmr.msra.gmra.mxu3 %vm86_vm1, %v1656_v20  ;;  %v1554_v56 = vld [vmem:[#allocation5 + $0x60] sm:$0xf]  ;;  %v1674_v57 = vld [vmem:[#allocation5 + $0x6c] sm:$0xf0]  ;;  %v1672_v58 = vld [vmem:[#allocation5 + $0x64] sm:$0xf]  ;;  %v1963_v60 = vor.u32 %v1677_v50, %v1580_v51  ;;  %v1969_v62 = vor.u32 %v1679_v55, %v1578_v54 }
  0x16   :  { %494 = vmatpush.bf16.msrb.mxu3 %v1923_v23  ;;  %481 = vmatpush.bf16.msrb.mxu2 %v1927_v25  ;;  %v1556_v59 = vld [vmem:[#allocation5 + $0x70] sm:$0xf0]  ;;  %v1673_v63 = vld [vmem:[#allocation5 + $0x6c] sm:$0xf]  ;;  %v1564_v0 = vld [vmem:[#allocation5 + $0x78] sm:$0xf0]  ;;  %v1973_v1 = vor.u32 %v1674_v57, %v1554_v56 }
  0x17   :  { %v1975_v2 = vor.u32 %v1672_v58, %v1556_v59  ;;  %v1562_v3 = vld [vmem:[#allocation5 + $0x68] sm:$0xf]  ;;  %v1675_v4 = vld [vmem:[#allocation5 + $0x74] sm:$0xf0]  ;;  %v1538_v5 = vld [vmem:[#allocation5 + $0x40] sm:$0xf]  ;;  %v1978_v10 = vor.u32 %v1673_v63, %v1564_v0 }
  0x18   :  { %456 = vmatpush.bf16.msrb.mxu0 %v1930_v28  ;;  %469 = vmatpush.bf16.msrb.mxu1 %v1932_v29  ;;  %v1670_v6 = vld [vmem:[#allocation5 + $0x4c] sm:$0xf0]  ;;  %v1668_v8 = vld [vmem:[#allocation5 + $0x44] sm:$0xf]  ;;  %v1540_v9 = vld [vmem:[#allocation5 + $0x50] sm:$0xf0]  ;;  %v1981_v11 = vor.u32 %v1675_v4, %v1562_v3 }
  0x19   :  { %v1985_v12 = vor.u32 %v1670_v6, %v1538_v5  ;;  %v1987_v13 = vor.u32 %v1668_v8, %v1540_v9  ;;  %v1546_v14 = vld [vmem:[#allocation5 + $0x48] sm:$0xf]  ;;  %v1671_v15 = vld [vmem:[#allocation5 + $0x54] sm:$0xf0]  ;;  %v1522_v18 = vld [vmem:[#allocation5 + $0x20] sm:$0xf] }
  0x1a   :  { %495 = vmatpush.bf16.msrb.mxu3 %v1938_v36  ;;  %482 = vmatpush.bf16.msrb.mxu2 %v1942_v37  ;;  %v1995_v17 = vor.u32 %v1671_v15, %v1546_v14  ;;  %v1666_v19 = vld [vmem:[#allocation5 + $0x2c] sm:$0xf0]  ;;  %v1664_v20 = vld [vmem:[#allocation5 + $0x24] sm:$0xf]  ;;  %v1524_v22 = vld [vmem:[#allocation5 + $0x30] sm:$0xf0] }
  0x1b   :  { %v1999_v21 = vor.u32 %v1666_v19, %v1522_v18  ;;  %v1530_v24 = vld [vmem:[#allocation5 + $0x28] sm:$0xf]  ;;  %v1667_v26 = vld [vmem:[#allocation5 + $0x34] sm:$0xf0]  ;;  %v2001_v27 = vor.u32 %v1664_v20, %v1524_v22  ;;  %v1669_v30 = vld [vmem:[#allocation5 + $0x4c] sm:$0xf] }
  0x1c   :  { %457 = vmatpush.bf16.msrb.mxu0 %v1946_v40  ;;  %470 = vmatpush.bf16.msrb.mxu1 %v1948_v41  ;;  %v1548_v31 = vld [vmem:[#allocation5 + $0x58] sm:$0xf0]  ;;  %v1506_v32 = vld [vmem:[#allocation5] sm:$0xf]  ;;  %v1662_v34 = vld [vmem:[#allocation5 + $0xc] sm:$0xf0]  ;;  %v2006_v39 = vor.u32 %v1667_v26, %v1530_v24 }
  0x1d   :  { %v2003_v33 = vor.u32 %v1669_v30, %v1548_v31  ;;  %v1660_v35 = vld [vmem:[#allocation5 + $0x4] sm:$0xf]  ;;  %v1508_v38 = vld [vmem:[#allocation5 + $0x10] sm:$0xf0]  ;;  %v1665_v42 = vld [vmem:[#allocation5 + $0x2c] sm:$0xf]  ;;  %v2010_v44 = vor.u32 %v1662_v34, %v1506_v32 }
  0x1e   :  { %496 = vmatpush.bf16.msrb.mxu3 %v1951_v48  ;;  %483 = vmatpush.bf16.msrb.mxu2 %v1954_v49  ;;  %v1532_v43 = vld [vmem:[#allocation5 + $0x38] sm:$0xf0]  ;;  %v2012_v45 = vor.u32 %v1660_v35, %v1508_v38  ;;  %v1514_v46 = vld [vmem:[#allocation5 + $0x8] sm:$0xf]  ;;  %v1663_v47 = vld [vmem:[#allocation5 + $0x14] sm:$0xf0] }
  0x1f   :  { %v2015_v50 = vor.u32 %v1665_v42, %v1532_v43  ;;  %v2018_v51 = vor.u32 %v1663_v47, %v1514_v46  ;;  %v1661_v54 = vld [vmem:[#allocation5 + $0xc] sm:$0xf]  ;;  %v1516_v55 = vld [vmem:[#allocation5 + $0x18] sm:$0xf0]  ;;  %v1659_v58 = vld [vmem:[%s2399_s0 + $0x18] sm:$0xff]  ;;  %v1880_v59 = vmov 0.0|0.0  }
  0x20   :  { %458 = vmatpush.bf16.msrb.mxu0 %v1958_v52  ;;  %471 = vmatpush.bf16.msrb.mxu1 %v1960_v53  ;;  %v1658_v56 = vld [vmem:[%s2399_s0 + $0x10] sm:$0xff]  ;;  %v2027_v57 = vor.u32 %v1661_v54, %v1516_v55  ;;  %v50_v0 = vld [vmem:[%s2402_s3] sm:$0xf]  ;;  %s1881_s3 = smov [#allocation8]  }
  0x21   :  { %v52_v3 = vperm.slane %v50_v0, 0  ;;  %v53_v5 = vperm.slane %v50_v0, 1  ;;  %v2116_v18 = vperm.slane %v50_v0, 3  ;;  %v54_v19 = vperm.slane %v50_v0, 2  ;;  %s1460_s5 = sshll.u32 %s1881_s3, 4  ;;  %s1461_s5 = int_to_ptr.vmem [resolvable:$true] %s1460_s5 }
  0x22   :  { %497 = vmatpush.bf16.msrb.mxu3 %v1963_v60  ;;  %484 = vmatpush.bf16.msrb.mxu2 %v1969_v62 }
  0x23   :  { %1489 = vmatmul.msk.bf16.gmra.mxu0 %vm86_vm1, %v1657_v61  ;;  %1493 = vmatmul.msk.bf16.gmra.mxu1 %vm86_vm1, %v1657_v61 }
  0x24   :  { %459 = vmatpush.bf16.msrb.mxu0 %v1973_v1  ;;  %472 = vmatpush.bf16.msrb.mxu1 %v1975_v2 }
  0x25   :  { %1497 = vmatmul.msk.bf16.gmra.mxu2 %vm86_vm1, %v1657_v61  ;;  %1501 = vmatmul.msk.bf16.gmra.mxu3 %vm86_vm1, %v1657_v61 }
  0x26   :  { %498 = vmatpush.bf16.msrb.mxu3 %v1978_v10  ;;  %485 = vmatpush.bf16.msrb.mxu2 %v1981_v11 }
  0x28   :  { %460 = vmatpush.bf16.msrb.mxu0 %v1985_v12  ;;  %473 = vmatpush.bf16.msrb.mxu1 %v1987_v13 }
  0x2a   :  { %486 = vmatpush.bf16.msrb.mxu2 %v1995_v17  ;;  %499 = vmatpush.bf16.msrb.mxu3 %v2003_v33 }
  0x2c   :  { %461 = vmatpush.bf16.msrb.mxu0 %v1999_v21  ;;  %474 = vmatpush.bf16.msrb.mxu1 %v2001_v27 }
  0x2e   :  { %487 = vmatpush.bf16.msrb.mxu2 %v2006_v39  ;;  %500 = vmatpush.bf16.msrb.mxu3 %v2015_v50 }
  0x30   :  { %462 = vmatpush.bf16.msrb.mxu0 %v2010_v44  ;;  %475 = vmatpush.bf16.msrb.mxu1 %v2012_v45 }
  0x32   :  { %488 = vmatpush.bf16.msrb.mxu2 %v2018_v51  ;;  %501 = vmatpush.bf16.msrb.mxu3 %v2027_v57 }
  0x33   :  { %1490 = vmatmul.msk.bf16.gmra.mxu0 %vm86_vm1, %v1658_v56  ;;  %1494 = vmatmul.msk.bf16.gmra.mxu1 %vm86_vm1, %v1658_v56 }
  0x34   :  { %580 = vmatpush.bf16.msra.mxu0 %v1913_v7  ;;  %593 = vmatpush.bf16.msra.mxu1 %v1915_v16 }
  0x35   :  { %1498 = vmatmul.msk.bf16.gmra.mxu2 %vm86_vm1, %v1658_v56  ;;  %1502 = vmatmul.msk.bf16.gmra.mxu3 %vm86_vm1, %v1658_v56 }
  0x36   :  { %606 = vmatpush.bf16.msra.mxu2 %v1927_v25  ;;  %619 = vmatpush.bf16.msra.mxu3 %v1923_v23 }
  0x38   :  { %581 = vmatpush.bf16.msra.mxu0 %v1930_v28  ;;  %594 = vmatpush.bf16.msra.mxu1 %v1932_v29 }
  0x3a   :  { %607 = vmatpush.bf16.msra.mxu2 %v1942_v37  ;;  %620 = vmatpush.bf16.msra.mxu3 %v1938_v36 }
  0x3c   :  { %582 = vmatpush.bf16.msra.mxu0 %v1946_v40  ;;  %595 = vmatpush.bf16.msra.mxu1 %v1948_v41 }
  0x3e   :  { %608 = vmatpush.bf16.msra.mxu2 %v1954_v49  ;;  %621 = vmatpush.bf16.msra.mxu3 %v1951_v48 }
  0x40   :  { %583 = vmatpush.bf16.msra.mxu0 %v1958_v52  ;;  %596 = vmatpush.bf16.msra.mxu1 %v1960_v53 }
  0x42   :  { %609 = vmatpush.bf16.msra.mxu2 %v1969_v62  ;;  %622 = vmatpush.bf16.msra.mxu3 %v1963_v60 }
  0x43   :  { %1491 = vmatmul.msk.bf16.gmra.mxu0 %vm86_vm1, %v1659_v58  ;;  %1495 = vmatmul.msk.bf16.gmra.mxu1 %vm86_vm1, %v1659_v58 }
  0x44   :  { %584 = vmatpush.bf16.msra.mxu0 %v1973_v1  ;;  %597 = vmatpush.bf16.msra.mxu1 %v1975_v2 }
  0x45   :  { %1499 = vmatmul.msk.bf16.gmra.mxu2 %vm86_vm1, %v1659_v58  ;;  %1503 = vmatmul.msk.bf16.gmra.mxu3 %vm86_vm1, %v1659_v58 }
  0x46   :  { %610 = vmatpush.bf16.msra.mxu2 %v1981_v11  ;;  %623 = vmatpush.bf16.msra.mxu3 %v1978_v10 }
  0x48   :  { %585 = vmatpush.bf16.msra.mxu0 %v1985_v12  ;;  %598 = vmatpush.bf16.msra.mxu1 %v1987_v13 }
  0x4a   :  { %611 = vmatpush.bf16.msra.mxu2 %v1995_v17  ;;  %624 = vmatpush.bf16.msra.mxu3 %v2003_v33 }
  0x4c   :  { %586 = vmatpush.bf16.msra.mxu0 %v1999_v21  ;;  %599 = vmatpush.bf16.msra.mxu1 %v2001_v27 }
  0x4e   :  { %612 = vmatpush.bf16.msra.mxu2 %v2006_v39  ;;  %625 = vmatpush.bf16.msra.mxu3 %v2015_v50 }
  0x50   :  { %587 = vmatpush.bf16.msra.mxu0 %v2010_v44  ;;  %600 = vmatpush.bf16.msra.mxu1 %v2012_v45 }
  0x52   :  { %613 = vmatpush.bf16.msra.mxu2 %v2018_v51  ;;  %626 = vmatpush.bf16.msra.mxu3 %v2027_v57 }
  0x53   :  { %463 = vmatmul.bf16.vlgmr.msrb.gmra.mxu0 %v1880_v59  ;;  %476 = vmatmul.bf16.vlgmr.msrb.gmra.mxu1 %v1880_v59 }
  0x54   :  { %705 = vmatpush.bf16.msrb.mxu0 %v1913_v7  ;;  %718 = vmatpush.bf16.msrb.mxu1 %v1915_v16 }
  0x55   :  { %489 = vmatmul.bf16.vlgmr.msrb.gmra.mxu2 %v1880_v59  ;;  %502 = vmatmul.bf16.vlgmr.msrb.gmra.mxu3 %v1880_v59 }
  0x56   :  { %731 = vmatpush.bf16.msrb.mxu2 %v1927_v25  ;;  %744 = vmatpush.bf16.msrb.mxu3 %v1923_v23 }
  0x58   :  { %706 = vmatpush.bf16.msrb.mxu0 %v1930_v28  ;;  %719 = vmatpush.bf16.msrb.mxu1 %v1932_v29 }
  0x5a   :  { %732 = vmatpush.bf16.msrb.mxu2 %v1942_v37  ;;  %745 = vmatpush.bf16.msrb.mxu3 %v1938_v36 }
  0x5c   :  { %707 = vmatpush.bf16.msrb.mxu0 %v1946_v40  ;;  %720 = vmatpush.bf16.msrb.mxu1 %v1948_v41 }
  0x5e   :  { %733 = vmatpush.bf16.msrb.mxu2 %v1954_v49  ;;  %746 = vmatpush.bf16.msrb.mxu3 %v1951_v48 }
  0x60   :  { %708 = vmatpush.bf16.msrb.mxu0 %v1958_v52  ;;  %721 = vmatpush.bf16.msrb.mxu1 %v1960_v53 }
  0x62   :  { %734 = vmatpush.bf16.msrb.mxu2 %v1969_v62  ;;  %747 = vmatpush.bf16.msrb.mxu3 %v1963_v60 }
  0x64   :  { %709 = vmatpush.bf16.msrb.mxu0 %v1973_v1  ;;  %722 = vmatpush.bf16.msrb.mxu1 %v1975_v2 }
  0x66   :  { %735 = vmatpush.bf16.msrb.mxu2 %v1981_v11  ;;  %748 = vmatpush.bf16.msrb.mxu3 %v1978_v10 }
  0x68   :  { %710 = vmatpush.bf16.msrb.mxu0 %v1985_v12  ;;  %723 = vmatpush.bf16.msrb.mxu1 %v1987_v13 }
  0x6a   :  { %736 = vmatpush.bf16.msrb.mxu2 %v1995_v17  ;;  %749 = vmatpush.bf16.msrb.mxu3 %v2003_v33 }
  0x6c   :  { %711 = vmatpush.bf16.msrb.mxu0 %v1999_v21  ;;  %724 = vmatpush.bf16.msrb.mxu1 %v2001_v27 }
  0x6e   :  { %737 = vmatpush.bf16.msrb.mxu2 %v2006_v39  ;;  %750 = vmatpush.bf16.msrb.mxu3 %v2015_v50 }
  0x70   :  { %712 = vmatpush.bf16.msrb.mxu0 %v2010_v44  ;;  %725 = vmatpush.bf16.msrb.mxu1 %v2012_v45 }
  0x72   :  { %738 = vmatpush.bf16.msrb.mxu2 %v2018_v51  ;;  %751 = vmatpush.bf16.msrb.mxu3 %v2027_v57 }
  0x90   :  { %v117_v61 = vpop.f32.mrf.mxu0  ;;  %v146_v63 = vpop.f32.mrf.mxu1 }
  0x98   :  { %v2108_v4 = vpop.f32.mrf.mxu2  ;;  %v2110_v6 = vpop.f32.mrf.mxu3 }
  0x99   :  { %v119_v8 = vpop.f32.mrf.mxu0  ;;  %v148_v14 = vpop.f32.mrf.mxu1 }
  0x9a   :  { %v2112_v9 = vadd.f32 %v119_v8, %v52_v3  ;;  %v2114_v15 = vadd.f32 %v148_v14, %v53_v5 }
  0xa0   :  { %v177_v20 = vpop.f32.mrf.mxu2  ;;  %v206_v24 = vpop.f32.mrf.mxu3 }
  0xa1   :  { %v2118_v22 = vadd.f32 %v177_v20, %v54_v19  ;;  %v122_v26 = vpop.f32.mrf.mxu0  ;;  %v2121_v30 = vadd.f32 %v206_v24, %v2116_v18  ;;  %v151_v32 = vpop.f32.mrf.mxu1 }
  0xa2   :  { %v2123_v31 = vadd.f32 %v122_v26, %v52_v3  ;;  %v2125_v34 = vadd.f32 %v151_v32, %v53_v5 }
  0xa8   :  { %v180_v35 = vpop.f32.mrf.mxu2  ;;  %v209_v42 = vpop.f32.mrf.mxu3 }
  0xa9   :  { %v2127_v38 = vadd.f32 %v180_v35, %v54_v19  ;;  %v124_v43 = vpop.f32.mrf.mxu0  ;;  %v2130_v46 = vadd.f32 %v209_v42, %v2116_v18  ;;  %v153_v54 = vpop.f32.mrf.mxu1 }
  0xaa   :  { %v2132_v47 = vadd.f32 %v124_v43, %v52_v3  ;;  %v2134_v55 = vadd.f32 %v153_v54, %v53_v5 }
  0xab   :  { %2404 = vst [vmem:[#allocation11_spill] sm:$0xff] %v2127_v38 }
  0xac   :  { %2405 = vst [vmem:[#allocation12_spill] sm:$0xff] %v2130_v46 }
  0xad   :  { %2406 = vst [vmem:[#allocation13_spill] sm:$0xff] %v2132_v47 }
  0xae   :  { %2407 = vst [vmem:[#allocation14_spill] sm:$0xff] %v2134_v55 }
  0xb0   :  { %v182_v56 = vpop.f32.mrf.mxu2  ;;  %v211_v59 = vpop.f32.mrf.mxu3 }
  0xb1   :  { %v2136_v58 = vadd.f32 %v182_v56, %v54_v19  ;;  %v127_v0 = vpop.f32.mrf.mxu0  ;;  %v2139_v8 = vadd.f32 %v211_v59, %v2116_v18  ;;  %v156_v20 = vpop.f32.mrf.mxu1 }
  0xb2   :  { %v2141_v14 = vadd.f32 %v127_v0, %v52_v3  ;;  %v2143_v24 = vadd.f32 %v156_v20, %v53_v5 }
  0xb3   :  { %2408 = vst [vmem:[#allocation15_spill] sm:$0xff] %v2136_v58 }
  0xb4   :  { %2409 = vst [vmem:[#allocation16_spill] sm:$0xff] %v2139_v8 }
  0xb5   :  { %2410 = vst [vmem:[#allocation17_spill] sm:$0xff] %v2141_v14 }
  0xb6   :  { %2411 = vst [vmem:[#allocation18_spill] sm:$0xff] %v2143_v24 }
  0xb8   :  { %v185_v26 = vpop.f32.mrf.mxu2  ;;  %v214_v35 = vpop.f32.mrf.mxu3 }
  0xb9   :  { %v2145_v32 = vadd.f32 %v185_v26, %v54_v19  ;;  %v129_v42 = vpop.f32.mrf.mxu0  ;;  %v2148_v43 = vadd.f32 %v214_v35, %v2116_v18  ;;  %v158_v56 = vpop.f32.mrf.mxu1 }
  0xba   :  { %v2150_v54 = vadd.f32 %v129_v42, %v52_v3  ;;  %v2152_v58 = vadd.f32 %v158_v56, %v53_v5 }
  0xbb   :  { %2412 = vst [vmem:[#allocation19_spill] sm:$0xff] %v2145_v32 }
  0xbc   :  { %2413 = vst [vmem:[#allocation20_spill] sm:$0xff] %v2148_v43 }
  0xbd   :  { %2414 = vst [vmem:[#allocation21_spill] sm:$0xff] %v2150_v54 }
  0xbe   :  { %2415 = vst [vmem:[#allocation22_spill] sm:$0xff] %v2152_v58 }
  0xc0   :  { %v187_v59 = vpop.f32.mrf.mxu2  ;;  %v216_v0 = vpop.f32.mrf.mxu3 }
  0xc1   :  { %v2154_v8 = vadd.f32 %v187_v59, %v54_v19  ;;  %v132_v14 = vpop.f32.mrf.mxu0  ;;  %v2157_v20 = vadd.f32 %v216_v0, %v2116_v18  ;;  %v161_v32 = vpop.f32.mrf.mxu1  ;;  %v118_v0 = vadd.f32 %v117_v61, %v52_v3 }
  0xc2   :  { %v2159_v26 = vadd.f32 %v132_v14, %v52_v3  ;;  %v2161_v24 = vadd.f32 %v161_v32, %v53_v5  ;;  %v147_v14 = vadd.f32 %v146_v63, %v53_v5 }
  0xc3   :  { %2416 = vst [vmem:[#allocation23_spill] sm:$0xff] %v2154_v8 }
  0xc4   :  { %2417 = vst [vmem:[#allocation24_spill] sm:$0xff] %v2157_v20 }
  0xc5   :  { %2418 = vst [vmem:[#allocation25_spill] sm:$0xff] %v2159_v26 }
  0xc6   :  { %2419 = vst [vmem:[#allocation26_spill] sm:$0xff] %v2161_v24 }
  0xc8   :  { %v190_v35 = vpop.f32.mrf.mxu2  ;;  %v219_v42 = vpop.f32.mrf.mxu3 }
  0xc9   :  { %v2163_v43 = vadd.f32 %v190_v35, %v54_v19  ;;  %v134_v54 = vpop.f32.mrf.mxu0  ;;  %v2166_v56 = vadd.f32 %v219_v42, %v2116_v18  ;;  %v163_v8 = vpop.f32.mrf.mxu1 }
  0xca   :  { %v2168_v59 = vadd.f32 %v134_v54, %v52_v3  ;;  %v2170_v58 = vadd.f32 %v163_v8, %v53_v5  ;;  %v176_v54 = vadd.f32 %v2108_v4, %v54_v19  ;;  %v205_v4 = vadd.f32 %v2110_v6, %v2116_v18 }
  0xcb   :  { %2420 = vst [vmem:[#allocation27_spill] sm:$0xff] %v2163_v43 }
  0xcc   :  { %2421 = vst [vmem:[#allocation28_spill] sm:$0xff] %v2166_v56 }
  0xcd   :  { %2422 = vst [vmem:[#allocation29_spill] sm:$0xff] %v2168_v59 }
  0xce   :  { %2423 = vst [vmem:[#allocation30_spill] sm:$0xff] %v2170_v58 }
  0xd0   :  { %v192_v20 = vpop.f32.mrf.mxu2  ;;  %v221_v32 = vpop.f32.mrf.mxu3 }
  0xd1   :  { %v2172_v26 = vadd.f32 %v192_v20, %v54_v19  ;;  %v464_v24 = vpop.f32.mrf.mxu0  ;;  %v2175_v35 = vadd.f32 %v221_v32, %v2116_v18  ;;  %v477_v55 = vpop.f32.mrf.mxu1 }
  0xd2   :  { %v507_v43 = vadd.f32 %v464_v24, %v118_v0  ;;  %v508_v47 = vadd.f32 %v477_v55, %v147_v14 }
  0xd3   :  { %2424 = vst [vmem:[#allocation31_spill] sm:$0xff] %v2172_v26 }
  0xd4   :  { %2425 = vst [vmem:[#allocation32_spill] sm:$0xff] %v2175_v35  ;;  %v1632_v42 = vmul.f32 -1.442695, %v507_v43  ;;  %v1633_v56 = vmul.f32 -1.442695, %v508_v47 }
  0xd6   :  { %1697 = vpow2.f32 %v1632_v42 }
  0xd7   :  { %1699 = vpow2.f32 %v1633_v56 }
  0xd8   :  { %v490_v8 = vpop.f32.mrf.mxu2  ;;  %v503_v3 = vpop.f32.mrf.mxu3 }
  0xd9   :  { %v509_v61 = vadd.f32 %v490_v8, %v176_v54  ;;  %v466_v63 = vpop.f32.mrf.mxu0  ;;  %v479_v5 = vpop.f32.mrf.mxu1  ;;  %v510_v56 = vadd.f32 %v503_v3, %v205_v4 }
  0xdb   :  { %v1634_v20 = vmul.f32 -1.442695, %v509_v61 }
  0xdc   :  { %v1698_v26 = vpop.eup %1697 }
  0xdd   :  { %v1700_v58 = vpop.eup %1699  ;;  %v520_v59 = vadd.f32 1.0, %v1698_v26  ;;  %1701 = vpow2.f32 %v1634_v20 }
  0xde   :  { %v521_v32 = vadd.f32 1.0, %v1700_v58 }
  0xdf   :  { %1703 = vrcp.f32 %v520_v59  ;;  %v534_v26 = vand.u32 2147483648, %v520_v59  ;;  %v532_v63 = vand.u32 2147483647, %v520_v59  ;;  %vm528_vm4 = vweird.f32 %v520_v59 }
  0xe0   :  { %1705 = vrcp.f32 %v521_v32  ;;  %v492_v55 = vpop.f32.mrf.mxu2  ;;  %v505_v24 = vpop.f32.mrf.mxu3  ;;  %v549_v58 = vand.u32 2147483648, %v521_v32  ;;  %v547_v20 = vand.u32 2147483647, %v521_v32  ;;  %vm543_vm5 = vweird.f32 %v521_v32 }
  0xe1   :  { %v535_v3 = vor.u32 1.1754944e-38, %v534_v26  ;;  %vm533_vm7 = vcmp.eq.f32.partialorder %v532_v63, 8.507059e+37 }
  0xe2   :  { %vm548_vm9 = vcmp.eq.f32.partialorder %v547_v20, 8.507059e+37 }
  0xe3   :  { %v1702_v47 = vpop.eup %1701 }
  0xe4   :  { %v522_v19 = vadd.f32 1.0, %v1702_v47  ;;  %v550_v47 = vor.u32 1.1754944e-38, %v549_v58 }
  0xe5   :  { %v1704_v43 = vpop.eup %1703 }
  0xe6   :  { %v1706_v0 = vpop.eup %1705  ;;  %v524_v14 = vmul.f32 %v1704_v43, %v520_v59  ;;  %1707 = vrcp.f32 %v522_v19  ;;  %vm529_vm2 = vweird.f32 %v1704_v43  ;;  %vm558_vm11 = vweird.f32 %v522_v19 }
  0xe7   :  { %v539_v42 = vmul.f32 %v1706_v0, %v521_v32  ;;  %1709 = vtanh.f32 %v510_v56  ;;  %vm544_vm3 = vweird.f32 %v1706_v0  ;;  %vm530_vm6 = vmor %vm528_vm4, %vm529_vm2  ;;  %v564_v32 = vand.u32 2147483648, %v522_v19 }
  0xe8   :  { %v525_v54 = vsub.f32 1.0, %v524_v14  ;;  %vm545_vm8 = vmor %vm543_vm5, %vm544_vm3 }
  0xe9   :  { %v540_v8 = vsub.f32 1.0, %v539_v42  ;;  %v565_v58 = vor.u32 1.1754944e-38, %v564_v32 }
  0xea   :  { %v526_v61 = vmul.f32 %v1704_v43, %v525_v54 }
  0xeb   :  { %v541_v5 = vmul.f32 %v1706_v0, %v540_v8 }
  0xec   :  { %v1708_v55 = vpop.eup %1707  ;;  %v527_v6 = vadd.f32 %v1704_v43, %v526_v61 }
  0xed   :  { %v554_v18 = vmul.f32 %v1708_v55, %v522_v19  ;;  %v542_v24 = vadd.f32 %v1706_v0, %v541_v5  ;;  %v1710_v56 = vpop.eup %1709  ;;  %vm559_vm10 = vweird.f32 %v1708_v55 }
  0xee   :  { %v531_v4 = vsel %vm530_vm6, %v1704_v43, %v527_v6  ;;  %v562_v43 = vand.u32 2147483647, %v522_v19  ;;  %vm560_vm12 = vmor %vm558_vm11, %vm559_vm10 }
  0xef   :  { %v555_v14 = vsub.f32 1.0, %v554_v18  ;;  %v536_v42 = vsel %vm533_vm7, %v535_v3, %v531_v4  ;;  %v546_v54 = vsel %vm545_vm8, %v1706_v0, %v542_v24 }
  0xf0   :  { %v551_v8 = vsel %vm548_vm9, %v550_v47, %v546_v54  ;;  %v570_v35 = vmul.f32 %v1710_v56, %v536_v42  ;;  %vm563_vm13 = vcmp.eq.f32.partialorder %v562_v43, 8.507059e+37 }
  0xf1   :  { %v569_v46 = vmul.f32 0.0, %v551_v8  ;;  %v556_v38 = vmul.f32 %v1708_v55, %v555_v14 }
  0xf3   :  { %v2180_v61 = vadd.f32 %v570_v35, %v569_v46  ;;  %v557_v59 = vadd.f32 %v1708_v55, %v556_v38 }
  0xf5   :  { %1711 = vtanh.f32 %v2180_v61  ;;  %v561_v26 = vsel %vm560_vm12, %v1708_v55, %v557_v59 }
  0xf6   :  { %v566_v0 = vsel %vm563_vm13, %v565_v58, %v561_v26 }
  0xfb   :  { %v1712_v63 = vpop.eup %1711 }
  0xfc   :  { %v573_v5 = vmul.f32 %v1712_v63, %v566_v0 }
  0xfe   :  { %v579_v20 = vpack.c.bf16 %v573_v5, %v573_v5 }
 0x100   :  { %588 = vmatmul.bf16.vlgmr.msra.gmra.mxu0 %v579_v20  ;;  %601 = vmatmul.bf16.vlgmr.msra.gmra.mxu1 %v579_v20 }
 0x101   :  { %614 = vmatmul.bf16.vlgmr.msra.gmra.mxu2 %v579_v20  ;;  %627 = vmatmul.bf16.vlgmr.msra.gmra.mxu3 %v579_v20 }
 0x102   :  { %830 = vmatpush.bf16.msra.mxu0 %v1913_v7  ;;  %843 = vmatpush.bf16.msra.mxu1 %v1915_v16 }
 0x103   :  { %856 = vmatpush.bf16.msra.mxu2 %v1927_v25  ;;  %869 = vmatpush.bf16.msra.mxu3 %v1923_v23 }
 0x106   :  { %831 = vmatpush.bf16.msra.mxu0 %v1930_v28  ;;  %844 = vmatpush.bf16.msra.mxu1 %v1932_v29 }
 0x107   :  { %857 = vmatpush.bf16.msra.mxu2 %v1942_v37  ;;  %870 = vmatpush.bf16.msra.mxu3 %v1938_v36 }
 0x10a   :  { %832 = vmatpush.bf16.msra.mxu0 %v1946_v40  ;;  %845 = vmatpush.bf16.msra.mxu1 %v1948_v41 }
 0x10b   :  { %858 = vmatpush.bf16.msra.mxu2 %v1954_v49  ;;  %871 = vmatpush.bf16.msra.mxu3 %v1951_v48 }
 0x10e   :  { %833 = vmatpush.bf16.msra.mxu0 %v1958_v52  ;;  %846 = vmatpush.bf16.msra.mxu1 %v1960_v53 }
 0x10f   :  { %859 = vmatpush.bf16.msra.mxu2 %v1969_v62  ;;  %872 = vmatpush.bf16.msra.mxu3 %v1963_v60 }
 0x112   :  { %834 = vmatpush.bf16.msra.mxu0 %v1973_v1  ;;  %847 = vmatpush.bf16.msra.mxu1 %v1975_v2 }
 0x113   :  { %860 = vmatpush.bf16.msra.mxu2 %v1981_v11  ;;  %873 = vmatpush.bf16.msra.mxu3 %v1978_v10 }
 0x116   :  { %835 = vmatpush.bf16.msra.mxu0 %v1985_v12  ;;  %848 = vmatpush.bf16.msra.mxu1 %v1987_v13 }
 0x117   :  { %861 = vmatpush.bf16.msra.mxu2 %v1995_v17  ;;  %874 = vmatpush.bf16.msra.mxu3 %v2003_v33 }
 0x11a   :  { %836 = vmatpush.bf16.msra.mxu0 %v1999_v21  ;;  %849 = vmatpush.bf16.msra.mxu1 %v2001_v27 }
 0x11b   :  { %862 = vmatpush.bf16.msra.mxu2 %v2006_v39  ;;  %875 = vmatpush.bf16.msra.mxu3 %v2015_v50 }
 0x11e   :  { %837 = vmatpush.bf16.msra.mxu0 %v2010_v44  ;;  %850 = vmatpush.bf16.msra.mxu1 %v2012_v45 }
 0x11f   :  { %863 = vmatpush.bf16.msra.mxu2 %v2018_v51  ;;  %876 = vmatpush.bf16.msra.mxu3 %v2027_v57 }
 0x17d   :  { %v589_v38 = vpop.f32.mrf.mxu0  ;;  %v602_v46 = vpop.f32.mrf.mxu1 }
 0x17e   :  { %v632_v35 = vadd.f32 %v589_v38, %v2112_v9  ;;  %v633_v19 = vadd.f32 %v602_v46, %v2114_v15 }
 0x180   :  { %v1635_v55 = vmul.f32 -1.442695, %v632_v35  ;;  %v1636_v6 = vmul.f32 -1.442695, %v633_v19 }
 0x182   :  { %1713 = vpow2.f32 %v1635_v55 }
 0x183   :  { %1715 = vpow2.f32 %v1636_v6 }
 0x184   :  { %v615_v18 = vpop.f32.mrf.mxu2  ;;  %v628_v3 = vpop.f32.mrf.mxu3 }
 0x185   :  { %v634_v24 = vadd.f32 %v615_v18, %v2118_v22  ;;  %v591_v47 = vpop.f32.mrf.mxu0  ;;  %v604_v4 = vpop.f32.mrf.mxu1  ;;  %v635_v26 = vadd.f32 %v628_v3, %v2121_v30 }
 0x187   :  { %v1637_v56 = vmul.f32 -1.442695, %v634_v24 }
 0x188   :  { %v1714_v14 = vpop.eup %1713 }
 0x189   :  { %v1716_v42 = vpop.eup %1715  ;;  %v645_v54 = vadd.f32 1.0, %v1714_v14  ;;  %1717 = vpow2.f32 %v1637_v56 }
 0x18a   :  { %v646_v8 = vadd.f32 1.0, %v1716_v42 }
 0x18b   :  { %1719 = vrcp.f32 %v645_v54  ;;  %v659_v20 = vand.u32 2147483648, %v645_v54  ;;  %v657_v35 = vand.u32 2147483647, %v645_v54  ;;  %vm653_vm0 = vweird.f32 %v645_v54 }
 0x18c   :  { %1721 = vrcp.f32 %v646_v8  ;;  %v617_v9 = vpop.f32.mrf.mxu2  ;;  %v630_v15 = vpop.f32.mrf.mxu3  ;;  %v674_v38 = vand.u32 2147483648, %v646_v8  ;;  %v672_v55 = vand.u32 2147483647, %v646_v8  ;;  %vm668_vm1 = vweird.f32 %v646_v8 }
 0x18d   :  { %v660_v3 = vor.u32 1.1754944e-38, %v659_v20  ;;  %vm658_vm4 = vcmp.eq.f32.partialorder %v657_v35, 8.507059e+37 }
 0x18e   :  { %v675_v47 = vor.u32 1.1754944e-38, %v674_v38  ;;  %vm673_vm5 = vcmp.eq.f32.partialorder %v672_v55, 8.507059e+37 }
 0x18f   :  { %v1718_v59 = vpop.eup %1717 }
 0x190   :  { %v647_v32 = vadd.f32 1.0, %v1718_v59 }
 0x191   :  { %v1720_v43 = vpop.eup %1719 }
 0x192   :  { %v1722_v58 = vpop.eup %1721  ;;  %v649_v63 = vmul.f32 %v1720_v43, %v645_v54  ;;  %1723 = vrcp.f32 %v647_v32  ;;  %vm654_vm14 = vweird.f32 %v1720_v43  ;;  %vm683_vm7 = vweird.f32 %v647_v32 }
 0x193   :  { %v664_v22 = vmul.f32 %v1722_v58, %v646_v8  ;;  %1725 = vtanh.f32 %v635_v26  ;;  %vm669_vm15 = vweird.f32 %v1722_v58  ;;  %vm655_vm2 = vmor %vm653_vm0, %vm654_vm14 }
 0x194   :  { %v650_v0 = vsub.f32 1.0, %v649_v63  ;;  %vm670_vm3 = vmor %vm668_vm1, %vm669_vm15 }
 0x195   :  { %v665_v5 = vsub.f32 1.0, %v664_v22  ;;  %v689_v22 = vand.u32 2147483648, %v647_v32 }
 0x196   :  { %v651_v46 = vmul.f32 %v1720_v43, %v650_v0 }
 0x197   :  { %v666_v19 = vmul.f32 %v1722_v58, %v665_v5  ;;  %v690_v5 = vor.u32 1.1754944e-38, %v689_v22 }
 0x198   :  { %v1724_v6 = vpop.eup %1723  ;;  %v652_v18 = vadd.f32 %v1720_v43, %v651_v46 }
 0x199   :  { %v679_v30 = vmul.f32 %v1724_v6, %v647_v32  ;;  %v667_v24 = vadd.f32 %v1722_v58, %v666_v19  ;;  %v1726_v56 = vpop.eup %1725  ;;  %vm684_vm6 = vweird.f32 %v1724_v6 }
 0x19a   :  { %v656_v4 = vsel %vm655_vm2, %v1720_v43, %v652_v18  ;;  %v687_v43 = vand.u32 2147483647, %v647_v32  ;;  %vm685_vm8 = vmor %vm683_vm7, %vm684_vm6 }
 0x19b   :  { %v680_v14 = vsub.f32 1.0, %v679_v30  ;;  %v661_v42 = vsel %vm658_vm4, %v660_v3, %v656_v4  ;;  %v671_v9 = vsel %vm670_vm3, %v1722_v58, %v667_v24  ;;  %v2426_v3 = vld [vmem:[#allocation11_spill] sm:$0xff] }
 0x19c   :  { %v676_v15 = vsel %vm673_vm5, %v675_v47, %v671_v9  ;;  %v695_v59 = vmul.f32 %v1726_v56, %v661_v42  ;;  %vm688_vm9 = vcmp.eq.f32.partialorder %v687_v43, 8.507059e+37 }
 0x19d   :  { %v694_v26 = vmul.f32 %v676_v15, %v2180_v61  ;;  %v681_v63 = vmul.f32 %v1724_v6, %v680_v14 }
 0x19f   :  { %v2220_v54 = vadd.f32 %v695_v59, %v694_v26  ;;  %v682_v8 = vadd.f32 %v1724_v6, %v681_v63 }
 0x1a1   :  { %1727 = vtanh.f32 %v2220_v54  ;;  %v686_v0 = vsel %vm685_vm8, %v1724_v6, %v682_v8  ;;  %v2427_v8 = vld [vmem:[#allocation12_spill] sm:$0xff] }
 0x1a2   :  { %v691_v20 = vsel %vm688_vm9, %v690_v5, %v686_v0 }
 0x1a7   :  { %v1728_v58 = vpop.eup %1727 }
 0x1a8   :  { %v698_v38 = vmul.f32 %v1728_v58, %v691_v20 }
 0x1aa   :  { %v704_v46 = vpack.c.bf16 %v698_v38, %v698_v38 }
 0x1ac   :  { %713 = vmatmul.bf16.vlgmr.msrb.gmra.mxu0 %v704_v46  ;;  %726 = vmatmul.bf16.vlgmr.msrb.gmra.mxu1 %v704_v46 }
 0x1ad   :  { %739 = vmatmul.bf16.vlgmr.msrb.gmra.mxu2 %v704_v46  ;;  %752 = vmatmul.bf16.vlgmr.msrb.gmra.mxu3 %v704_v46 }
 0x1ae   :  { %955 = vmatpush.bf16.msrb.mxu0 %v1913_v7  ;;  %968 = vmatpush.bf16.msrb.mxu1 %v1915_v16 }
 0x1af   :  { %981 = vmatpush.bf16.msrb.mxu2 %v1927_v25  ;;  %994 = vmatpush.bf16.msrb.mxu3 %v1923_v23 }
 0x1b2   :  { %956 = vmatpush.bf16.msrb.mxu0 %v1930_v28  ;;  %969 = vmatpush.bf16.msrb.mxu1 %v1932_v29 }
 0x1b3   :  { %982 = vmatpush.bf16.msrb.mxu2 %v1942_v37  ;;  %995 = vmatpush.bf16.msrb.mxu3 %v1938_v36 }
 0x1b6   :  { %957 = vmatpush.bf16.msrb.mxu0 %v1946_v40  ;;  %970 = vmatpush.bf16.msrb.mxu1 %v1948_v41 }
 0x1b7   :  { %983 = vmatpush.bf16.msrb.mxu2 %v1954_v49  ;;  %996 = vmatpush.bf16.msrb.mxu3 %v1951_v48 }
 0x1ba   :  { %958 = vmatpush.bf16.msrb.mxu0 %v1958_v52  ;;  %971 = vmatpush.bf16.msrb.mxu1 %v1960_v53 }
 0x1bb   :  { %984 = vmatpush.bf16.msrb.mxu2 %v1969_v62  ;;  %997 = vmatpush.bf16.msrb.mxu3 %v1963_v60 }
 0x1be   :  { %959 = vmatpush.bf16.msrb.mxu0 %v1973_v1  ;;  %972 = vmatpush.bf16.msrb.mxu1 %v1975_v2 }
 0x1bf   :  { %985 = vmatpush.bf16.msrb.mxu2 %v1981_v11  ;;  %998 = vmatpush.bf16.msrb.mxu3 %v1978_v10 }
 0x1c2   :  { %960 = vmatpush.bf16.msrb.mxu0 %v1985_v12  ;;  %973 = vmatpush.bf16.msrb.mxu1 %v1987_v13 }
 0x1c3   :  { %986 = vmatpush.bf16.msrb.mxu2 %v1995_v17  ;;  %999 = vmatpush.bf16.msrb.mxu3 %v2003_v33 }
 0x1c6   :  { %961 = vmatpush.bf16.msrb.mxu0 %v1999_v21  ;;  %974 = vmatpush.bf16.msrb.mxu1 %v2001_v27 }
 0x1c7   :  { %987 = vmatpush.bf16.msrb.mxu2 %v2006_v39  ;;  %1000 = vmatpush.bf16.msrb.mxu3 %v2015_v50 }
 0x1ca   :  { %962 = vmatpush.bf16.msrb.mxu0 %v2010_v44  ;;  %975 = vmatpush.bf16.msrb.mxu1 %v2012_v45 }
 0x1cb   :  { %988 = vmatpush.bf16.msrb.mxu2 %v2018_v51  ;;  %1001 = vmatpush.bf16.msrb.mxu3 %v2027_v57 }
 0x229   :  { %v714_v61 = vpop.f32.mrf.mxu0  ;;  %v727_v32 = vpop.f32.mrf.mxu1 }
 0x22a   :  { %v757_v35 = vadd.f32 %v714_v61, %v2123_v31  ;;  %v758_v19 = vadd.f32 %v727_v32, %v2125_v34 }
 0x22c   :  { %v1638_v55 = vmul.f32 -1.442695, %v757_v35  ;;  %v1639_v6 = vmul.f32 -1.442695, %v758_v19 }
 0x22e   :  { %1729 = vpow2.f32 %v1638_v55 }
 0x22f   :  { %1731 = vpow2.f32 %v1639_v6 }
 0x230   :  { %v740_v18 = vpop.f32.mrf.mxu2  ;;  %v753_v30 = vpop.f32.mrf.mxu3 }
 0x231   :  { %v759_v24 = vadd.f32 %v740_v18, %v2426_v3  ;;  %v716_v47 = vpop.f32.mrf.mxu0  ;;  %v729_v4 = vpop.f32.mrf.mxu1  ;;  %v760_v22 = vadd.f32 %v753_v30, %v2427_v8 }
 0x233   :  { %v1640_v56 = vmul.f32 -1.442695, %v759_v24 }
 0x234   :  { %v1730_v14 = vpop.eup %1729 }
 0x235   :  { %v1732_v42 = vpop.eup %1731  ;;  %v770_v9 = vadd.f32 1.0, %v1730_v14  ;;  %1733 = vpow2.f32 %v1640_v56 }
 0x236   :  { %v771_v15 = vadd.f32 1.0, %v1732_v42 }
 0x237   :  { %1735 = vrcp.f32 %v770_v9  ;;  %v784_v38 = vand.u32 2147483648, %v770_v9  ;;  %v782_v32 = vand.u32 2147483647, %v770_v9  ;;  %vm778_vm12 = vweird.f32 %v770_v9 }
 0x238   :  { %1737 = vrcp.f32 %v771_v15  ;;  %v742_v31 = vpop.f32.mrf.mxu2  ;;  %v755_v34 = vpop.f32.mrf.mxu3  ;;  %v799_v46 = vand.u32 2147483648, %v771_v15  ;;  %v797_v19 = vand.u32 2147483647, %v771_v15  ;;  %vm793_vm13 = vweird.f32 %v771_v15 }
 0x239   :  { %v785_v30 = vor.u32 1.1754944e-38, %v784_v38  ;;  %vm783_vm0 = vcmp.eq.f32.partialorder %v782_v32, 8.507059e+37  ;;  %v2429_v32 = vld [vmem:[#allocation14_spill] sm:$0xff] }
 0x23a   :  { %v800_v24 = vor.u32 1.1754944e-38, %v799_v46  ;;  %vm798_vm1 = vcmp.eq.f32.partialorder %v797_v19, 8.507059e+37  ;;  %v2428_v46 = vld [vmem:[#allocation13_spill] sm:$0xff] }
 0x23b   :  { %v1734_v59 = vpop.eup %1733 }
 0x23c   :  { %v772_v26 = vadd.f32 1.0, %v1734_v59 }
 0x23d   :  { %v1736_v63 = vpop.eup %1735 }
 0x23e   :  { %v1738_v43 = vpop.eup %1737  ;;  %v774_v0 = vmul.f32 %v1736_v63, %v770_v9  ;;  %1739 = vrcp.f32 %v772_v26  ;;  %vm779_vm10 = vweird.f32 %v1736_v63  ;;  %vm808_vm3 = vweird.f32 %v772_v26 }
 0x23f   :  { %v789_v5 = vmul.f32 %v1738_v43, %v771_v15  ;;  %1741 = vtanh.f32 %v760_v22  ;;  %vm794_vm11 = vweird.f32 %v1738_v43  ;;  %vm780_vm14 = vmor %vm778_vm12, %vm779_vm10  ;;  %v814_v22 = vand.u32 2147483648, %v772_v26 }
 0x240   :  { %v775_v58 = vsub.f32 1.0, %v774_v0  ;;  %vm795_vm15 = vmor %vm793_vm13, %vm794_vm11 }
 0x241   :  { %v790_v20 = vsub.f32 1.0, %v789_v5  ;;  %v815_v5 = vor.u32 1.1754944e-38, %v814_v22 }
 0x242   :  { %v776_v61 = vmul.f32 %v1736_v63, %v775_v58 }
 0x243   :  { %v791_v35 = vmul.f32 %v1738_v43, %v790_v20 }
 0x244   :  { %v1740_v55 = vpop.eup %1739  ;;  %v777_v6 = vadd.f32 %v1736_v63, %v776_v61 }
 0x245   :  { %v804_v18 = vmul.f32 %v1740_v55, %v772_v26  ;;  %v792_v3 = vadd.f32 %v1738_v43, %v791_v35  ;;  %v1742_v4 = vpop.eup %1741  ;;  %vm809_vm2 = vweird.f32 %v1740_v55 }
 0x246   :  { %v781_v47 = vsel %vm780_vm14, %v1736_v63, %v777_v6  ;;  %v812_v63 = vand.u32 2147483647, %v772_v26  ;;  %vm810_vm4 = vmor %vm808_vm3, %vm809_vm2 }
 0x247   :  { %v805_v56 = vsub.f32 1.0, %v804_v18  ;;  %v786_v14 = vsel %vm783_vm0, %v785_v30, %v781_v47  ;;  %v796_v42 = vsel %vm795_vm15, %v1738_v43, %v792_v3  ;;  %v2430_v30 = vld [vmem:[#allocation15_spill] sm:$0xff] }
 0x248   :  { %v801_v31 = vsel %vm798_vm1, %v800_v24, %v796_v42  ;;  %v820_v34 = vmul.f32 %v1742_v4, %v786_v14  ;;  %vm813_vm5 = vcmp.eq.f32.partialorder %v812_v63, 8.507059e+37  ;;  %v2431_v63 = vld [vmem:[#allocation16_spill] sm:$0xff] }
 0x249   :  { %v819_v59 = vmul.f32 %v801_v31, %v2220_v54  ;;  %v806_v8 = vmul.f32 %v1740_v55, %v805_v56 }
 0x24b   :  { %v2260_v9 = vadd.f32 %v820_v34, %v819_v59  ;;  %v807_v15 = vadd.f32 %v1740_v55, %v806_v8 }
 0x24d   :  { %1743 = vtanh.f32 %v2260_v9  ;;  %v811_v0 = vsel %vm810_vm4, %v1740_v55, %v807_v15 }
 0x24e   :  { %v816_v58 = vsel %vm813_vm5, %v815_v5, %v811_v0 }
 0x253   :  { %v1744_v43 = vpop.eup %1743 }
 0x254   :  { %v823_v20 = vmul.f32 %v1744_v43, %v816_v58 }
 0x256   :  { %v829_v38 = vpack.c.bf16 %v823_v20, %v823_v20 }
 0x258   :  { %838 = vmatmul.bf16.vlgmr.msra.gmra.mxu0 %v829_v38  ;;  %851 = vmatmul.bf16.vlgmr.msra.gmra.mxu1 %v829_v38 }
 0x259   :  { %864 = vmatmul.bf16.vlgmr.msra.gmra.mxu2 %v829_v38  ;;  %877 = vmatmul.bf16.vlgmr.msra.gmra.mxu3 %v829_v38 }
 0x25a   :  { %1080 = vmatpush.bf16.msra.mxu0 %v1913_v7  ;;  %1093 = vmatpush.bf16.msra.mxu1 %v1915_v16 }
 0x25b   :  { %1106 = vmatpush.bf16.msra.mxu2 %v1927_v25  ;;  %1119 = vmatpush.bf16.msra.mxu3 %v1923_v23 }
 0x25e   :  { %1081 = vmatpush.bf16.msra.mxu0 %v1930_v28  ;;  %1094 = vmatpush.bf16.msra.mxu1 %v1932_v29 }
 0x25f   :  { %1107 = vmatpush.bf16.msra.mxu2 %v1942_v37  ;;  %1120 = vmatpush.bf16.msra.mxu3 %v1938_v36 }
 0x262   :  { %1082 = vmatpush.bf16.msra.mxu0 %v1946_v40  ;;  %1095 = vmatpush.bf16.msra.mxu1 %v1948_v41 }
 0x263   :  { %1108 = vmatpush.bf16.msra.mxu2 %v1954_v49  ;;  %1121 = vmatpush.bf16.msra.mxu3 %v1951_v48 }
 0x266   :  { %1083 = vmatpush.bf16.msra.mxu0 %v1958_v52  ;;  %1096 = vmatpush.bf16.msra.mxu1 %v1960_v53 }
 0x267   :  { %1109 = vmatpush.bf16.msra.mxu2 %v1969_v62  ;;  %1122 = vmatpush.bf16.msra.mxu3 %v1963_v60 }
 0x26a   :  { %1084 = vmatpush.bf16.msra.mxu0 %v1973_v1  ;;  %1097 = vmatpush.bf16.msra.mxu1 %v1975_v2 }
 0x26b   :  { %1110 = vmatpush.bf16.msra.mxu2 %v1981_v11  ;;  %1123 = vmatpush.bf16.msra.mxu3 %v1978_v10 }
 0x26e   :  { %1085 = vmatpush.bf16.msra.mxu0 %v1985_v12  ;;  %1098 = vmatpush.bf16.msra.mxu1 %v1987_v13 }
 0x26f   :  { %1111 = vmatpush.bf16.msra.mxu2 %v1995_v17  ;;  %1124 = vmatpush.bf16.msra.mxu3 %v2003_v33 }
 0x272   :  { %1086 = vmatpush.bf16.msra.mxu0 %v1999_v21  ;;  %1099 = vmatpush.bf16.msra.mxu1 %v2001_v27 }
 0x273   :  { %1112 = vmatpush.bf16.msra.mxu2 %v2006_v39  ;;  %1125 = vmatpush.bf16.msra.mxu3 %v2015_v50 }
 0x276   :  { %1087 = vmatpush.bf16.msra.mxu0 %v2010_v44  ;;  %1100 = vmatpush.bf16.msra.mxu1 %v2012_v45 }
 0x277   :  { %1113 = vmatpush.bf16.msra.mxu2 %v2018_v51  ;;  %1126 = vmatpush.bf16.msra.mxu3 %v2027_v57 }
 0x2d5   :  { %v839_v54 = vpop.f32.mrf.mxu0  ;;  %v852_v26 = vpop.f32.mrf.mxu1 }
 0x2d6   :  { %v882_v61 = vadd.f32 %v839_v54, %v2428_v46  ;;  %v883_v35 = vadd.f32 %v852_v26, %v2429_v32 }
 0x2d8   :  { %v1641_v19 = vmul.f32 -1.442695, %v882_v61  ;;  %v1642_v55 = vmul.f32 -1.442695, %v883_v35 }
 0x2da   :  { %1745 = vpow2.f32 %v1641_v19 }
 0x2db   :  { %1747 = vpow2.f32 %v1642_v55 }
 0x2dc   :  { %v865_v6 = vpop.f32.mrf.mxu2  ;;  %v878_v18 = vpop.f32.mrf.mxu3 }
 0x2dd   :  { %v884_v3 = vadd.f32 %v865_v6, %v2430_v30  ;;  %v841_v24 = vpop.f32.mrf.mxu0  ;;  %v854_v47 = vpop.f32.mrf.mxu1  ;;  %v885_v0 = vadd.f32 %v878_v18, %v2431_v63 }
 0x2df   :  { %v1643_v4 = vmul.f32 -1.442695, %v884_v3 }
 0x2e0   :  { %v1746_v56 = vpop.eup %1745 }
 0x2e1   :  { %v1748_v14 = vpop.eup %1747  ;;  %v895_v42 = vadd.f32 1.0, %v1746_v56  ;;  %1749 = vpow2.f32 %v1643_v4 }
 0x2e2   :  { %v896_v31 = vadd.f32 1.0, %v1748_v14 }
 0x2e3   :  { %1751 = vrcp.f32 %v895_v42  ;;  %v909_v54 = vand.u32 2147483648, %v895_v42  ;;  %v907_v61 = vand.u32 2147483647, %v895_v42  ;;  %vm903_vm8 = vweird.f32 %v895_v42 }
 0x2e4   :  { %1753 = vrcp.f32 %v896_v31  ;;  %v867_v34 = vpop.f32.mrf.mxu2  ;;  %v880_v59 = vpop.f32.mrf.mxu3  ;;  %v924_v26 = vand.u32 2147483648, %v896_v31  ;;  %v922_v35 = vand.u32 2147483647, %v896_v31  ;;  %vm918_vm9 = vweird.f32 %v896_v31 }
 0x2e5   :  { %v910_v18 = vor.u32 1.1754944e-38, %v909_v54  ;;  %vm908_vm12 = vcmp.eq.f32.partialorder %v907_v61, 8.507059e+37  ;;  %v2433_v61 = vld [vmem:[#allocation18_spill] sm:$0xff] }
 0x2e6   :  { %v925_v3 = vor.u32 1.1754944e-38, %v924_v26  ;;  %vm923_vm13 = vcmp.eq.f32.partialorder %v922_v35, 8.507059e+37  ;;  %v2432_v26 = vld [vmem:[#allocation17_spill] sm:$0xff] }
 0x2e7   :  { %v1750_v8 = vpop.eup %1749 }
 0x2e8   :  { %v897_v15 = vadd.f32 1.0, %v1750_v8 }
 0x2e9   :  { %v1752_v22 = vpop.eup %1751 }
 0x2ea   :  { %v1754_v5 = vpop.eup %1753  ;;  %v899_v43 = vmul.f32 %v1752_v22, %v895_v42  ;;  %1755 = vrcp.f32 %v897_v15  ;;  %vm904_vm6 = vweird.f32 %v1752_v22  ;;  %vm933_vm15 = vweird.f32 %v897_v15 }
 0x2eb   :  { %v914_v58 = vmul.f32 %v1754_v5, %v896_v31  ;;  %1757 = vtanh.f32 %v885_v0  ;;  %vm919_vm7 = vweird.f32 %v1754_v5  ;;  %vm905_vm10 = vmor %vm903_vm8, %vm904_vm6  ;;  %v939_v0 = vand.u32 2147483648, %v897_v15 }
 0x2ec   :  { %v900_v20 = vsub.f32 1.0, %v899_v43  ;;  %vm920_vm11 = vmor %vm918_vm9, %vm919_vm7 }
 0x2ed   :  { %v915_v38 = vsub.f32 1.0, %v914_v58  ;;  %v940_v58 = vor.u32 1.1754944e-38, %v939_v0 }
 0x2ee   :  { %v901_v46 = vmul.f32 %v1752_v22, %v900_v20 }
 0x2ef   :  { %v916_v32 = vmul.f32 %v1754_v5, %v915_v38 }
 0x2f0   :  { %v1756_v19 = vpop.eup %1755  ;;  %v902_v55 = vadd.f32 %v1752_v22, %v901_v46 }
 0x2f1   :  { %v929_v6 = vmul.f32 %v1756_v19, %v897_v15  ;;  %v917_v30 = vadd.f32 %v1754_v5, %v916_v32  ;;  %v1758_v47 = vpop.eup %1757  ;;  %vm934_vm14 = vweird.f32 %v1756_v19 }
 0x2f2   :  { %v906_v24 = vsel %vm905_vm10, %v1752_v22, %v902_v55  ;;  %v937_v22 = vand.u32 2147483647, %v897_v15  ;;  %vm935_vm0 = vmor %vm933_vm15, %vm934_vm14 }
 0x2f3   :  { %v930_v4 = vsub.f32 1.0, %v929_v6  ;;  %v911_v56 = vsel %vm908_vm12, %v910_v18, %v906_v24  ;;  %v921_v14 = vsel %vm920_vm11, %v1754_v5, %v917_v30  ;;  %v2434_v18 = vld [vmem:[#allocation19_spill] sm:$0xff] }
 0x2f4   :  { %v926_v34 = vsel %vm923_vm13, %v925_v3, %v921_v14  ;;  %v945_v59 = vmul.f32 %v1758_v47, %v911_v56  ;;  %vm938_vm1 = vcmp.eq.f32.partialorder %v937_v22, 8.507059e+37  ;;  %v2435_v22 = vld [vmem:[#allocation20_spill] sm:$0xff] }
 0x2f5   :  { %v944_v8 = vmul.f32 %v926_v34, %v2260_v9  ;;  %v931_v63 = vmul.f32 %v1756_v19, %v930_v4 }
 0x2f7   :  { %v2300_v42 = vadd.f32 %v945_v59, %v944_v8  ;;  %v932_v31 = vadd.f32 %v1756_v19, %v931_v63 }
 0x2f9   :  { %1759 = vtanh.f32 %v2300_v42  ;;  %v936_v43 = vsel %vm935_vm0, %v1756_v19, %v932_v31 }
 0x2fa   :  { %v941_v20 = vsel %vm938_vm1, %v940_v58, %v936_v43 }
 0x2ff   :  { %v1760_v5 = vpop.eup %1759 }
 0x300   :  { %v948_v38 = vmul.f32 %v1760_v5, %v941_v20 }
 0x302   :  { %v954_v54 = vpack.c.bf16 %v948_v38, %v948_v38 }
 0x304   :  { %963 = vmatmul.bf16.vlgmr.msrb.gmra.mxu0 %v954_v54  ;;  %976 = vmatmul.bf16.vlgmr.msrb.gmra.mxu1 %v954_v54 }
 0x305   :  { %989 = vmatmul.bf16.vlgmr.msrb.gmra.mxu2 %v954_v54  ;;  %1002 = vmatmul.bf16.vlgmr.msrb.gmra.mxu3 %v954_v54 }
 0x306   :  { %1205 = vmatpush.bf16.msrb.mxu0 %v1913_v7  ;;  %1218 = vmatpush.bf16.msrb.mxu1 %v1915_v16 }
 0x307   :  { %1231 = vmatpush.bf16.msrb.mxu2 %v1927_v25  ;;  %1244 = vmatpush.bf16.msrb.mxu3 %v1923_v23 }
 0x30a   :  { %1206 = vmatpush.bf16.msrb.mxu0 %v1930_v28  ;;  %1219 = vmatpush.bf16.msrb.mxu1 %v1932_v29 }
 0x30b   :  { %1232 = vmatpush.bf16.msrb.mxu2 %v1942_v37  ;;  %1245 = vmatpush.bf16.msrb.mxu3 %v1938_v36 }
 0x30e   :  { %1207 = vmatpush.bf16.msrb.mxu0 %v1946_v40  ;;  %1220 = vmatpush.bf16.msrb.mxu1 %v1948_v41 }
 0x30f   :  { %1233 = vmatpush.bf16.msrb.mxu2 %v1954_v49  ;;  %1246 = vmatpush.bf16.msrb.mxu3 %v1951_v48 }
 0x312   :  { %1208 = vmatpush.bf16.msrb.mxu0 %v1958_v52  ;;  %1221 = vmatpush.bf16.msrb.mxu1 %v1960_v53 }
 0x313   :  { %1234 = vmatpush.bf16.msrb.mxu2 %v1969_v62  ;;  %1247 = vmatpush.bf16.msrb.mxu3 %v1963_v60 }
 0x316   :  { %1209 = vmatpush.bf16.msrb.mxu0 %v1973_v1  ;;  %1222 = vmatpush.bf16.msrb.mxu1 %v1975_v2 }
 0x317   :  { %1235 = vmatpush.bf16.msrb.mxu2 %v1981_v11  ;;  %1248 = vmatpush.bf16.msrb.mxu3 %v1978_v10 }
 0x31a   :  { %1210 = vmatpush.bf16.msrb.mxu0 %v1985_v12  ;;  %1223 = vmatpush.bf16.msrb.mxu1 %v1987_v13 }
 0x31b   :  { %1236 = vmatpush.bf16.msrb.mxu2 %v1995_v17  ;;  %1249 = vmatpush.bf16.msrb.mxu3 %v2003_v33 }
 0x31e   :  { %1211 = vmatpush.bf16.msrb.mxu0 %v1999_v21  ;;  %1224 = vmatpush.bf16.msrb.mxu1 %v2001_v27 }
 0x31f   :  { %1237 = vmatpush.bf16.msrb.mxu2 %v2006_v39  ;;  %1250 = vmatpush.bf16.msrb.mxu3 %v2015_v50 }
 0x322   :  { %1212 = vmatpush.bf16.msrb.mxu0 %v2010_v44  ;;  %1225 = vmatpush.bf16.msrb.mxu1 %v2012_v45 }
 0x323   :  { %1238 = vmatpush.bf16.msrb.mxu2 %v2018_v51  ;;  %1251 = vmatpush.bf16.msrb.mxu3 %v2027_v57 }
 0x381   :  { %v964_v9 = vpop.f32.mrf.mxu0  ;;  %v977_v15 = vpop.f32.mrf.mxu1 }
 0x382   :  { %v1007_v46 = vadd.f32 %v964_v9, %v2432_v26  ;;  %v1008_v32 = vadd.f32 %v977_v15, %v2433_v61 }
 0x384   :  { %v1644_v35 = vmul.f32 -1.442695, %v1007_v46  ;;  %v1645_v19 = vmul.f32 -1.442695, %v1008_v32 }
 0x386   :  { %1761 = vpow2.f32 %v1644_v35 }
 0x387   :  { %1763 = vpow2.f32 %v1645_v19 }
 0x388   :  { %v990_v55 = vpop.f32.mrf.mxu2  ;;  %v1003_v6 = vpop.f32.mrf.mxu3 }
 0x389   :  { %v1009_v30 = vadd.f32 %v990_v55, %v2434_v18  ;;  %v966_v3 = vpop.f32.mrf.mxu0  ;;  %v979_v24 = vpop.f32.mrf.mxu1  ;;  %v1010_v43 = vadd.f32 %v1003_v6, %v2435_v22 }
 0x38b   :  { %v1646_v47 = vmul.f32 -1.442695, %v1009_v30 }
 0x38c   :  { %v1762_v4 = vpop.eup %1761 }
 0x38d   :  { %v1764_v56 = vpop.eup %1763  ;;  %v1020_v14 = vadd.f32 1.0, %v1762_v4  ;;  %1765 = vpow2.f32 %v1646_v47 }
 0x38e   :  { %v1021_v34 = vadd.f32 1.0, %v1764_v56 }
 0x38f   :  { %1767 = vrcp.f32 %v1020_v14  ;;  %v1034_v9 = vand.u32 2147483648, %v1020_v14  ;;  %v1032_v46 = vand.u32 2147483647, %v1020_v14  ;;  %vm1028_vm4 = vweird.f32 %v1020_v14 }
 0x390   :  { %1769 = vrcp.f32 %v1021_v34  ;;  %v992_v59 = vpop.f32.mrf.mxu2  ;;  %v1005_v8 = vpop.f32.mrf.mxu3  ;;  %v1049_v15 = vand.u32 2147483648, %v1021_v34  ;;  %v1047_v32 = vand.u32 2147483647, %v1021_v34  ;;  %vm1043_vm5 = vweird.f32 %v1021_v34 }
 0x391   :  { %v1035_v6 = vor.u32 1.1754944e-38, %v1034_v9  ;;  %vm1033_vm8 = vcmp.eq.f32.partialorder %v1032_v46, 8.507059e+37 }
 0x392   :  { %v1050_v30 = vor.u32 1.1754944e-38, %v1049_v15  ;;  %vm1048_vm9 = vcmp.eq.f32.partialorder %v1047_v32, 8.507059e+37 }
 0x393   :  { %v1766_v63 = vpop.eup %1765 }
 0x394   :  { %v1022_v31 = vadd.f32 1.0, %v1766_v63 }
 0x395   :  { %v1768_v0 = vpop.eup %1767 }
 0x396   :  { %v1770_v58 = vpop.eup %1769  ;;  %v1024_v5 = vmul.f32 %v1768_v0, %v1020_v14  ;;  %1771 = vrcp.f32 %v1022_v31  ;;  %vm1029_vm2 = vweird.f32 %v1768_v0  ;;  %vm1058_vm11 = vweird.f32 %v1022_v31 }
 0x397   :  { %v1039_v20 = vmul.f32 %v1770_v58, %v1021_v34  ;;  %1773 = vtanh.f32 %v1010_v43  ;;  %vm1044_vm3 = vweird.f32 %v1770_v58  ;;  %vm1030_vm6 = vmor %vm1028_vm4, %vm1029_vm2  ;;  %v1064_v43 = vand.u32 2147483648, %v1022_v31 }
 0x398   :  { %v1025_v38 = vsub.f32 1.0, %v1024_v5  ;;  %vm1045_vm7 = vmor %vm1043_vm5, %vm1044_vm3 }
 0x399   :  { %v1040_v54 = vsub.f32 1.0, %v1039_v20  ;;  %v1065_v20 = vor.u32 1.1754944e-38, %v1064_v43 }
 0x39a   :  { %v1026_v26 = vmul.f32 %v1768_v0, %v1025_v38 }
 0x39b   :  { %v1041_v61 = vmul.f32 %v1770_v58, %v1040_v54 }
 0x39c   :  { %v1772_v35 = vpop.eup %1771  ;;  %v1027_v19 = vadd.f32 %v1768_v0, %v1026_v26 }
 0x39d   :  { %v1054_v55 = vmul.f32 %v1772_v35, %v1022_v31  ;;  %v1042_v18 = vadd.f32 %v1770_v58, %v1041_v61  ;;  %v1774_v24 = vpop.eup %1773  ;;  %vm1059_vm10 = vweird.f32 %v1772_v35 }
 0x39e   :  { %v1031_v3 = vsel %vm1030_vm6, %v1768_v0, %v1027_v19  ;;  %v1062_v0 = vand.u32 2147483647, %v1022_v31  ;;  %vm1060_vm12 = vmor %vm1058_vm11, %vm1059_vm10 }
 0x39f   :  { %v1055_v47 = vsub.f32 1.0, %v1054_v55  ;;  %v1036_v4 = vsel %vm1033_vm8, %v1035_v6, %v1031_v3  ;;  %v1046_v56 = vsel %vm1045_vm7, %v1770_v58, %v1042_v18 }
 0x3a0   :  { %v1051_v59 = vsel %vm1048_vm9, %v1050_v30, %v1046_v56  ;;  %v1070_v8 = vmul.f32 %v1774_v24, %v1036_v4  ;;  %vm1063_vm13 = vcmp.eq.f32.partialorder %v1062_v0, 8.507059e+37 }
 0x3a1   :  { %v1069_v63 = vmul.f32 %v1051_v59, %v2300_v42  ;;  %v1056_v22 = vmul.f32 %v1772_v35, %v1055_v47 }
 0x3a3   :  { %v2340_v14 = vadd.f32 %v1070_v8, %v1069_v63  ;;  %v1057_v34 = vadd.f32 %v1772_v35, %v1056_v22 }
 0x3a5   :  { %1775 = vtanh.f32 %v2340_v14  ;;  %v1061_v5 = vsel %vm1060_vm12, %v1772_v35, %v1057_v34 }
 0x3a6   :  { %v1066_v38 = vsel %vm1063_vm13, %v1065_v20, %v1061_v5 }
 0x3ab   :  { %v1776_v58 = vpop.eup %1775 }
 0x3ac   :  { %v1073_v54 = vmul.f32 %v1776_v58, %v1066_v38 }
 0x3ae   :  { %v1079_v9 = vpack.c.bf16 %v1073_v54, %v1073_v54 }
 0x3b0   :  { %1088 = vmatmul.bf16.vlgmr.msra.gmra.mxu0 %v1079_v9  ;;  %1101 = vmatmul.bf16.vlgmr.msra.gmra.mxu1 %v1079_v9 }
 0x3b1   :  { %1114 = vmatmul.bf16.vlgmr.msra.gmra.mxu2 %v1079_v9  ;;  %1127 = vmatmul.bf16.vlgmr.msra.gmra.mxu3 %v1079_v9 }
 0x3b2   :  { %1330 = vmatpush.bf16.msra.mxu0 %v1913_v7  ;;  %1343 = vmatpush.bf16.msra.mxu1 %v1915_v16 }
 0x3b3   :  { %1356 = vmatpush.bf16.msra.mxu2 %v1927_v25  ;;  %1369 = vmatpush.bf16.msra.mxu3 %v1923_v23  ;;  %v2436_v23 = vld [vmem:[#allocation21_spill] sm:$0xff] }
 0x3b6   :  { %1331 = vmatpush.bf16.msra.mxu0 %v1930_v28  ;;  %1344 = vmatpush.bf16.msra.mxu1 %v1932_v29  ;;  %v2437_v28 = vld [vmem:[#allocation22_spill] sm:$0xff] }
 0x3b7   :  { %1357 = vmatpush.bf16.msra.mxu2 %v1942_v37  ;;  %1370 = vmatpush.bf16.msra.mxu3 %v1938_v36 }
 0x3ba   :  { %1332 = vmatpush.bf16.msra.mxu0 %v1946_v40  ;;  %1345 = vmatpush.bf16.msra.mxu1 %v1948_v41 }
 0x3bb   :  { %1358 = vmatpush.bf16.msra.mxu2 %v1954_v49  ;;  %1371 = vmatpush.bf16.msra.mxu3 %v1951_v48  ;;  %v2438_v48 = vld [vmem:[#allocation23_spill] sm:$0xff] }
 0x3be   :  { %1333 = vmatpush.bf16.msra.mxu0 %v1958_v52  ;;  %1346 = vmatpush.bf16.msra.mxu1 %v1960_v53 }
 0x3bf   :  { %1359 = vmatpush.bf16.msra.mxu2 %v1969_v62  ;;  %1372 = vmatpush.bf16.msra.mxu3 %v1963_v60 }
 0x3c2   :  { %1334 = vmatpush.bf16.msra.mxu0 %v1973_v1  ;;  %1347 = vmatpush.bf16.msra.mxu1 %v1975_v2 }
 0x3c3   :  { %1360 = vmatpush.bf16.msra.mxu2 %v1981_v11  ;;  %1373 = vmatpush.bf16.msra.mxu3 %v1978_v10 }
 0x3c6   :  { %1335 = vmatpush.bf16.msra.mxu0 %v1985_v12  ;;  %1348 = vmatpush.bf16.msra.mxu1 %v1987_v13 }
 0x3c7   :  { %1361 = vmatpush.bf16.msra.mxu2 %v1995_v17  ;;  %1374 = vmatpush.bf16.msra.mxu3 %v2003_v33 }
 0x3ca   :  { %1336 = vmatpush.bf16.msra.mxu0 %v1999_v21  ;;  %1349 = vmatpush.bf16.msra.mxu1 %v2001_v27  ;;  %v2439_v27 = vld [vmem:[#allocation24_spill] sm:$0xff] }
 0x3cb   :  { %1362 = vmatpush.bf16.msra.mxu2 %v2006_v39  ;;  %1375 = vmatpush.bf16.msra.mxu3 %v2015_v50 }
 0x3ce   :  { %1337 = vmatpush.bf16.msra.mxu0 %v2010_v44  ;;  %1350 = vmatpush.bf16.msra.mxu1 %v2012_v45 }
 0x3cf   :  { %1363 = vmatpush.bf16.msra.mxu2 %v2018_v51  ;;  %1376 = vmatpush.bf16.msra.mxu3 %v2027_v57 }
 0x42d   :  { %v1089_v7 = vpop.f32.mrf.mxu0  ;;  %v1102_v16 = vpop.f32.mrf.mxu1 }
 0x42e   :  { %v1132_v25 = vadd.f32 %v1089_v7, %v2436_v23  ;;  %v1133_v29 = vadd.f32 %v1102_v16, %v2437_v28  ;;  %v2440_v7 = vld [vmem:[#allocation25_spill] sm:$0xff]  ;;  %v2441_v23 = vld [vmem:[#allocation26_spill] sm:$0xff] }
 0x430   :  { %v1647_v36 = vmul.f32 -1.442695, %v1132_v25  ;;  %v1648_v37 = vmul.f32 -1.442695, %v1133_v29 }
 0x432   :  { %1777 = vpow2.f32 %v1647_v36 }
 0x433   :  { %1779 = vpow2.f32 %v1648_v37 }
 0x434   :  { %v1115_v40 = vpop.f32.mrf.mxu2  ;;  %v1128_v41 = vpop.f32.mrf.mxu3 }
 0x435   :  { %v1134_v49 = vadd.f32 %v1115_v40, %v2438_v48  ;;  %v1091_v52 = vpop.f32.mrf.mxu0  ;;  %v1104_v53 = vpop.f32.mrf.mxu1  ;;  %v1135_v33 = vadd.f32 %v1128_v41, %v2439_v27  ;;  %v2442_v40 = vld [vmem:[#allocation27_spill] sm:$0xff] }
 0x437   :  { %v1649_v60 = vmul.f32 -1.442695, %v1134_v49 }
 0x438   :  { %v1778_v62 = vpop.eup %1777 }
 0x439   :  { %v1780_v1 = vpop.eup %1779  ;;  %v1145_v2 = vadd.f32 1.0, %v1778_v62  ;;  %1781 = vpow2.f32 %v1649_v60 }
 0x43a   :  { %v1146_v10 = vadd.f32 1.0, %v1780_v1 }
 0x43b   :  { %1783 = vrcp.f32 %v1145_v2  ;;  %v1159_v57 = vand.u32 2147483648, %v1145_v2  ;;  %v1157_v15 = vand.u32 2147483647, %v1145_v2  ;;  %vm1153_vm0 = vweird.f32 %v1145_v2 }
 0x43c   :  { %1785 = vrcp.f32 %v1146_v10  ;;  %v1117_v11 = vpop.f32.mrf.mxu2  ;;  %v1130_v12 = vpop.f32.mrf.mxu3  ;;  %v1174_v42 = vand.u32 2147483648, %v1146_v10  ;;  %v1172_v46 = vand.u32 2147483647, %v1146_v10  ;;  %vm1168_vm1 = vweird.f32 %v1146_v10 }
 0x43d   :  { %v1160_v19 = vor.u32 1.1754944e-38, %v1159_v57  ;;  %vm1158_vm4 = vcmp.eq.f32.partialorder %v1157_v15, 8.507059e+37 }
 0x43e   :  { %v1175_v6 = vor.u32 1.1754944e-38, %v1174_v42  ;;  %vm1173_vm5 = vcmp.eq.f32.partialorder %v1172_v46, 8.507059e+37 }
 0x43f   :  { %v1782_v13 = vpop.eup %1781 }
 0x440   :  { %v1147_v17 = vadd.f32 1.0, %v1782_v13 }
 0x441   :  { %v1784_v21 = vpop.eup %1783 }
 0x442   :  { %v1786_v39 = vpop.eup %1785  ;;  %v1149_v44 = vmul.f32 %v1784_v21, %v1145_v2  ;;  %1787 = vrcp.f32 %v1147_v17  ;;  %vm1154_vm14 = vweird.f32 %v1784_v21  ;;  %v1189_v34 = vand.u32 2147483648, %v1147_v17 }
 0x443   :  { %v1164_v45 = vmul.f32 %v1786_v39, %v1146_v10  ;;  %1789 = vtanh.f32 %v1135_v33  ;;  %vm1169_vm15 = vweird.f32 %v1786_v39  ;;  %vm1155_vm2 = vmor %vm1153_vm0, %vm1154_vm14  ;;  %vm1183_vm7 = vweird.f32 %v1147_v17 }
 0x444   :  { %v1150_v50 = vsub.f32 1.0, %v1149_v44  ;;  %vm1170_vm3 = vmor %vm1168_vm1, %vm1169_vm15  ;;  %v1187_v43 = vand.u32 2147483647, %v1147_v17  ;;  %v1190_v5 = vor.u32 1.1754944e-38, %v1189_v34 }
 0x445   :  { %v1165_v51 = vsub.f32 1.0, %v1164_v45 }
 0x446   :  { %v1151_v31 = vmul.f32 %v1784_v21, %v1150_v50  ;;  %vm1188_vm9 = vcmp.eq.f32.partialorder %v1187_v43, 8.507059e+37 }
 0x447   :  { %v1166_v26 = vmul.f32 %v1786_v39, %v1165_v51 }
 0x448   :  { %v1788_v61 = vpop.eup %1787  ;;  %v1152_v32 = vadd.f32 %v1784_v21, %v1151_v31 }
 0x449   :  { %v1179_v35 = vmul.f32 %v1788_v61, %v1147_v17  ;;  %v1167_v55 = vadd.f32 %v1786_v39, %v1166_v26  ;;  %v1790_v30 = vpop.eup %1789  ;;  %vm1184_vm6 = vweird.f32 %v1788_v61  ;;  %v2443_v17 = vld [vmem:[#allocation28_spill] sm:$0xff] }
 0x44a   :  { %v1156_v18 = vsel %vm1155_vm2, %v1784_v21, %v1152_v32  ;;  %vm1185_vm8 = vmor %vm1183_vm7, %vm1184_vm6 }
 0x44b   :  { %v1180_v3 = vsub.f32 1.0, %v1179_v35  ;;  %v1161_v24 = vsel %vm1158_vm4, %v1160_v19, %v1156_v18  ;;  %v1171_v47 = vsel %vm1170_vm3, %v1786_v39, %v1167_v55 }
 0x44c   :  { %v1176_v4 = vsel %vm1173_vm5, %v1175_v6, %v1171_v47  ;;  %v1195_v56 = vmul.f32 %v1790_v30, %v1161_v24 }
 0x44d   :  { %v1194_v59 = vmul.f32 %v1176_v4, %v2340_v14  ;;  %v1181_v8 = vmul.f32 %v1788_v61, %v1180_v3 }
 0x44f   :  { %v2380_v63 = vadd.f32 %v1195_v56, %v1194_v59  ;;  %v1182_v22 = vadd.f32 %v1788_v61, %v1181_v8 }
 0x451   :  { %1791 = vtanh.f32 %v2380_v63  ;;  %v1186_v0 = vsel %vm1185_vm8, %v1788_v61, %v1182_v22 }
 0x452   :  { %v1191_v58 = vsel %vm1188_vm9, %v1190_v5, %v1186_v0 }
 0x457   :  { %v1792_v20 = vpop.eup %1791 }
 0x458   :  { %v1198_v38 = vmul.f32 %v1792_v20, %v1191_v58 }
 0x45a   :  { %v1204_v54 = vpack.c.bf16 %v1198_v38, %v1198_v38 }
 0x45c   :  { %1213 = vmatmul.bf16.vlgmr.msrb.gmra.mxu0 %v1204_v54  ;;  %1226 = vmatmul.bf16.vlgmr.msrb.gmra.mxu1 %v1204_v54 }
 0x45d   :  { %1239 = vmatmul.bf16.vlgmr.msrb.gmra.mxu2 %v1204_v54  ;;  %1252 = vmatmul.bf16.vlgmr.msrb.gmra.mxu3 %v1204_v54 }
 0x4d9   :  { %v1214_v14 = vpop.f32.mrf.mxu0  ;;  %v1227_v9 = vpop.f32.mrf.mxu1 }
 0x4da   :  { %v1257_v16 = vadd.f32 %v1214_v14, %v2440_v7  ;;  %v1258_v25 = vadd.f32 %v1227_v9, %v2441_v23  ;;  %v2444_v14 = vld [vmem:[#allocation29_spill] sm:$0xff]  ;;  %v2445_v7 = vld [vmem:[#allocation30_spill] sm:$0xff] }
 0x4dc   :  { %v1650_v28 = vmul.f32 -1.442695, %v1257_v16  ;;  %v1651_v29 = vmul.f32 -1.442695, %v1258_v25 }
 0x4de   :  { %1793 = vpow2.f32 %v1650_v28 }
 0x4df   :  { %1795 = vpow2.f32 %v1651_v29 }
 0x4e0   :  { %v1240_v36 = vpop.f32.mrf.mxu2  ;;  %v1253_v37 = vpop.f32.mrf.mxu3 }
 0x4e1   :  { %v1259_v41 = vadd.f32 %v1240_v36, %v2442_v40  ;;  %v1216_v48 = vpop.f32.mrf.mxu0  ;;  %v1229_v49 = vpop.f32.mrf.mxu1  ;;  %v1260_v21 = vadd.f32 %v1253_v37, %v2443_v17  ;;  %v2446_v36 = vld [vmem:[#allocation31_spill] sm:$0xff] }
 0x4e3   :  { %v1652_v52 = vmul.f32 -1.442695, %v1259_v41 }
 0x4e4   :  { %v1794_v53 = vpop.eup %1793 }
 0x4e5   :  { %v1796_v60 = vpop.eup %1795  ;;  %v1270_v62 = vadd.f32 1.0, %v1794_v53  ;;  %1797 = vpow2.f32 %v1652_v52 }
 0x4e6   :  { %v1271_v1 = vadd.f32 1.0, %v1796_v60 }
 0x4e7   :  { %1799 = vrcp.f32 %v1270_v62  ;;  %v1284_v50 = vand.u32 2147483648, %v1270_v62  ;;  %v1282_v42 = vand.u32 2147483647, %v1270_v62  ;;  %vm1278_vm12 = vweird.f32 %v1270_v62 }
 0x4e8   :  { %1801 = vrcp.f32 %v1271_v1  ;;  %v1242_v2 = vpop.f32.mrf.mxu2  ;;  %v1255_v10 = vpop.f32.mrf.mxu3  ;;  %v1299_v51 = vand.u32 2147483648, %v1271_v1  ;;  %v1297_v15 = vand.u32 2147483647, %v1271_v1  ;;  %vm1293_vm13 = vweird.f32 %v1271_v1 }
 0x4e9   :  { %v1285_v32 = vor.u32 1.1754944e-38, %v1284_v50  ;;  %vm1283_vm0 = vcmp.eq.f32.partialorder %v1282_v42, 8.507059e+37 }
 0x4ea   :  { %v1300_v19 = vor.u32 1.1754944e-38, %v1299_v51  ;;  %vm1298_vm1 = vcmp.eq.f32.partialorder %v1297_v15, 8.507059e+37 }
 0x4eb   :  { %v1798_v11 = vpop.eup %1797 }
 0x4ec   :  { %v1272_v12 = vadd.f32 1.0, %v1798_v11 }
 0x4ed   :  { %v1800_v13 = vpop.eup %1799 }
 0x4ee   :  { %v1802_v27 = vpop.eup %1801  ;;  %v1274_v33 = vmul.f32 %v1800_v13, %v1270_v62  ;;  %1803 = vrcp.f32 %v1272_v12  ;;  %vm1279_vm10 = vweird.f32 %v1800_v13  ;;  %v1314_v22 = vand.u32 2147483648, %v1272_v12 }
 0x4ef   :  { %v1289_v39 = vmul.f32 %v1802_v27, %v1271_v1  ;;  %1805 = vtanh.f32 %v1260_v21  ;;  %vm1294_vm11 = vweird.f32 %v1802_v27  ;;  %vm1280_vm14 = vmor %vm1278_vm12, %vm1279_vm10  ;;  %vm1308_vm3 = vweird.f32 %v1272_v12 }
 0x4f0   :  { %v1275_v44 = vsub.f32 1.0, %v1274_v33  ;;  %vm1295_vm15 = vmor %vm1293_vm13, %vm1294_vm11  ;;  %v1312_v34 = vand.u32 2147483647, %v1272_v12  ;;  %v1315_v0 = vor.u32 1.1754944e-38, %v1314_v22 }
 0x4f1   :  { %v1290_v45 = vsub.f32 1.0, %v1289_v39 }
 0x4f2   :  { %v1276_v57 = vmul.f32 %v1800_v13, %v1275_v44  ;;  %vm1313_vm5 = vcmp.eq.f32.partialorder %v1312_v34, 8.507059e+37 }
 0x4f3   :  { %v1291_v31 = vmul.f32 %v1802_v27, %v1290_v45 }
 0x4f4   :  { %v1804_v26 = vpop.eup %1803  ;;  %v1277_v46 = vadd.f32 %v1800_v13, %v1276_v57 }
 0x4f5   :  { %v1304_v61 = vmul.f32 %v1804_v26, %v1272_v12  ;;  %v1292_v35 = vadd.f32 %v1802_v27, %v1291_v31  ;;  %v1806_v6 = vpop.eup %1805  ;;  %vm1309_vm2 = vweird.f32 %v1804_v26  ;;  %v2447_v12 = vld [vmem:[#allocation32_spill] sm:$0xff] }
 0x4f6   :  { %v1281_v55 = vsel %vm1280_vm14, %v1800_v13, %v1277_v46  ;;  %vm1310_vm4 = vmor %vm1308_vm3, %vm1309_vm2 }
 0x4f7   :  { %v1305_v18 = vsub.f32 1.0, %v1304_v61  ;;  %v1286_v30 = vsel %vm1283_vm0, %v1285_v32, %v1281_v55  ;;  %v1296_v3 = vsel %vm1295_vm15, %v1802_v27, %v1292_v35 }
 0x4f8   :  { %v1301_v24 = vsel %vm1298_vm1, %v1300_v19, %v1296_v3  ;;  %v1320_v47 = vmul.f32 %v1806_v6, %v1286_v30 }
 0x4f9   :  { %v1319_v4 = vmul.f32 %v1301_v24, %v2380_v63  ;;  %v1306_v56 = vmul.f32 %v1804_v26, %v1305_v18 }
 0x4fb   :  { %v2388_v59 = vadd.f32 %v1320_v47, %v1319_v4  ;;  %v1307_v8 = vadd.f32 %v1804_v26, %v1306_v56 }
 0x4fd   :  { %1807 = vtanh.f32 %v2388_v59  ;;  %v1311_v43 = vsel %vm1310_vm4, %v1804_v26, %v1307_v8 }
 0x4fe   :  { %v1316_v20 = vsel %vm1313_vm5, %v1315_v0, %v1311_v43 }
 0x503   :  { %v1808_v5 = vpop.eup %1807 }
 0x504   :  { %v1323_v58 = vmul.f32 %v1808_v5, %v1316_v20 }
 0x506   :  { %v1329_v38 = vpack.c.bf16 %v1323_v58, %v1323_v58 }
 0x508   :  { %1338 = vmatmul.bf16.vlgmr.msra.gmra.mxu0 %v1329_v38  ;;  %1351 = vmatmul.bf16.vlgmr.msra.gmra.mxu1 %v1329_v38 }
 0x509   :  { %1364 = vmatmul.bf16.vlgmr.msra.gmra.mxu2 %v1329_v38  ;;  %1377 = vmatmul.bf16.vlgmr.msra.gmra.mxu3 %v1329_v38 }
 0x585   :  { %v1339_v63 = vpop.f32.mrf.mxu0  ;;  %v1352_v54 = vpop.f32.mrf.mxu1 }
 0x586   :  { %v1382_v9 = vadd.f32 %v1339_v63, %v2444_v14  ;;  %v1383_v16 = vadd.f32 %v1352_v54, %v2445_v7 }
 0x588   :  { %v1653_v23 = vmul.f32 -1.442695, %v1382_v9  ;;  %v1654_v25 = vmul.f32 -1.442695, %v1383_v16 }
 0x58a   :  { %1809 = vpow2.f32 %v1653_v23 }
 0x58b   :  { %1811 = vpow2.f32 %v1654_v25 }
 0x58c   :  { %v1365_v28 = vpop.f32.mrf.mxu2  ;;  %v1378_v29 = vpop.f32.mrf.mxu3 }
 0x58d   :  { %v1384_v37 = vadd.f32 %v1365_v28, %v2446_v36  ;;  %v1341_v40 = vpop.f32.mrf.mxu0  ;;  %v1354_v41 = vpop.f32.mrf.mxu1  ;;  %v1385_v13 = vadd.f32 %v1378_v29, %v2447_v12 }
 0x58f   :  { %v1655_v48 = vmul.f32 -1.442695, %v1384_v37 }
 0x590   :  { %v1810_v49 = vpop.eup %1809 }
 0x591   :  { %v1812_v52 = vpop.eup %1811  ;;  %v1395_v53 = vadd.f32 1.0, %v1810_v49  ;;  %1813 = vpow2.f32 %v1655_v48 }
 0x592   :  { %v1396_v60 = vadd.f32 1.0, %v1812_v52 }
 0x593   :  { %1815 = vrcp.f32 %v1395_v53  ;;  %v1409_v44 = vand.u32 2147483648, %v1395_v53  ;;  %v1407_v51 = vand.u32 2147483647, %v1395_v53  ;;  %vm1403_vm8 = vweird.f32 %v1395_v53 }
 0x594   :  { %1817 = vrcp.f32 %v1396_v60  ;;  %v1367_v62 = vpop.f32.mrf.mxu2  ;;  %v1380_v1 = vpop.f32.mrf.mxu3  ;;  %v1424_v45 = vand.u32 2147483648, %v1396_v60  ;;  %v1422_v42 = vand.u32 2147483647, %v1396_v60  ;;  %vm1418_vm9 = vweird.f32 %v1396_v60 }
 0x595   :  { %v1410_v46 = vor.u32 1.1754944e-38, %v1409_v44  ;;  %vm1408_vm12 = vcmp.eq.f32.partialorder %v1407_v51, 8.507059e+37 }
 0x596   :  { %v1425_v32 = vor.u32 1.1754944e-38, %v1424_v45  ;;  %vm1423_vm13 = vcmp.eq.f32.partialorder %v1422_v42, 8.507059e+37 }
 0x597   :  { %v1814_v2 = vpop.eup %1813 }
 0x598   :  { %v1397_v10 = vadd.f32 1.0, %v1814_v2 }
 0x599   :  { %v1816_v11 = vpop.eup %1815 }
 0x59a   :  { %v1818_v17 = vpop.eup %1817  ;;  %v1399_v21 = vmul.f32 %v1816_v11, %v1395_v53  ;;  %1819 = vrcp.f32 %v1397_v10  ;;  %vm1404_vm6 = vweird.f32 %v1816_v11  ;;  %v1439_v8 = vand.u32 2147483648, %v1397_v10 }
 0x59b   :  { %v1414_v27 = vmul.f32 %v1818_v17, %v1396_v60  ;;  %1821 = vtanh.f32 %v1385_v13  ;;  %vm1419_vm7 = vweird.f32 %v1818_v17  ;;  %vm1405_vm10 = vmor %vm1403_vm8, %vm1404_vm6  ;;  %vm1433_vm15 = vweird.f32 %v1397_v10 }
 0x59c   :  { %v1400_v33 = vsub.f32 1.0, %v1399_v21  ;;  %vm1420_vm11 = vmor %vm1418_vm9, %vm1419_vm7  ;;  %v1437_v22 = vand.u32 2147483647, %v1397_v10  ;;  %v1440_v43 = vor.u32 1.1754944e-38, %v1439_v8 }
 0x59d   :  { %v1415_v39 = vsub.f32 1.0, %v1414_v27 }
 0x59e   :  { %v1401_v50 = vmul.f32 %v1816_v11, %v1400_v33  ;;  %vm1438_vm1 = vcmp.eq.f32.partialorder %v1437_v22, 8.507059e+37 }
 0x59f   :  { %v1416_v57 = vmul.f32 %v1818_v17, %v1415_v39 }
 0x5a0   :  { %v1820_v31 = vpop.eup %1819  ;;  %v1402_v15 = vadd.f32 %v1816_v11, %v1401_v50 }
 0x5a1   :  { %v1429_v26 = vmul.f32 %v1820_v31, %v1397_v10  ;;  %v1417_v61 = vadd.f32 %v1818_v17, %v1416_v57  ;;  %v1822_v19 = vpop.eup %1821  ;;  %vm1434_vm14 = vweird.f32 %v1820_v31 }
 0x5a2   :  { %v1406_v35 = vsel %vm1405_vm10, %v1816_v11, %v1402_v15  ;;  %vm1435_vm0 = vmor %vm1433_vm15, %vm1434_vm14 }
 0x5a3   :  { %v1430_v55 = vsub.f32 1.0, %v1429_v26  ;;  %v1411_v6 = vsel %vm1408_vm12, %v1410_v46, %v1406_v35  ;;  %v1421_v18 = vsel %vm1420_vm11, %v1818_v17, %v1417_v61 }
 0x5a4   :  { %v1426_v30 = vsel %vm1423_vm13, %v1425_v32, %v1421_v18  ;;  %v1445_v3 = vmul.f32 %v1822_v19, %v1411_v6 }
 0x5a5   :  { %v1444_v24 = vmul.f32 %v1426_v30, %v2388_v59  ;;  %v1431_v47 = vmul.f32 %v1820_v31, %v1430_v55 }
 0x5a7   :  { %v1446_v4 = vadd.f32 %v1445_v3, %v1444_v24  ;;  %v1432_v56 = vadd.f32 %v1820_v31, %v1431_v47 }
 0x5a9   :  { %1823 = vtanh.f32 %v1446_v4  ;;  %v1436_v34 = vsel %vm1435_vm0, %v1820_v31, %v1432_v56 }
 0x5aa   :  { %v1441_v59 = vsel %vm1438_vm1, %v1440_v43, %v1436_v34 }
 0x5af   :  { %v1824_v0 = vpop.eup %1823 }
 0x5b0   :  { %v1448_v5 = vmul.f32 %v1824_v0, %v1441_v59 }
 0x5b2   :  { %1454 = vst [vmem:[#allocation8] sm:$0xff] %v1448_v5 }
 0x5b3   :  { %1465 = dma.vmem_to_hbm [thread:$0]  %s1461_s5, 128, %s1463_s8, [#allocation7]  }
 0x5b4   :  { %1875 = dma.done.wait [#allocation7], 128  }
 0x5b5   :  { %1876 = vsyncadd [#allocation7], 4294967168 }
 0x5b6   :  { %1470 = vsyncpa [#allocation6], 1 }
 0x5b7   :  { %1471 = vsyncpa [#allocation7], 1 }

</bundles_post_ra>
